<compile_context>
chip_gen: v5e
topology: v5e:2x2
jax: 0.10.0
libtpu: 0.0.40
codegen_flags: <defaults>
</compile_context>

<pallas_src>
import math
import functools

import jax
import jax.numpy as jnp
from jax.experimental import pallas as pl
from jax.experimental.pallas import tpu as pltpu

# ----- model hyper-parameters (small, consistent with the module's __init__) -----
INPUT_DIM = 16
HIDDEN_DIM = 32          # d_model; also dim_feedforward (module passes hidden_dim as dim_feedforward)
OUTPUT_DIM = 8
NUM_LAYERS = 2
NUM_HEADS = 4
SEQ_LEN = 8
BATCH = 2
MAX_LEN = 256
LN_EPS = 1e-5
QKV_COLS = 128           # Wq|Wk|Wv packed along the lane axis, zero-padded to one full vreg lane width
assert 3 * HIDDEN_DIM <= QKV_COLS


# --------------------------------------------------------------------------------
# Single fused Pallas kernel: whole forward pass
# --------------------------------------------------------------------------------
def transformer_kernel(x_ref, pe_ref,
                       emb_w_ref, emb_b_ref,
                       wqkv_ref, bqkv_ref, wo_ref, bo_ref,
                       ln1_w_ref, ln1_b_ref,
                       w1_ref, b1_ref, w2_ref, b2_ref,
                       ln2_w_ref, ln2_b_ref,
                       fc_w_ref, fc_b_ref,
                       o_ref, *, num_heads, num_layers):
    S, B, D = x_ref.shape
    H = emb_w_ref.shape[1]
    hd = H // num_heads
    scale = 1.0 / math.sqrt(hd)

    # --- seq-first input consumed directly; go batch-major (row = b*S + s) in-kernel so
    #     attention can use leading-batch-dim einsums (no wrapper transpose / extra dispatch).
    x = x_ref[...]                                                        # (S, B, D)
    xf = jnp.concatenate([x[:, b, :] for b in range(B)], axis=0)          # (B*S, D), batch-major

    # --- embedding + positional encoding (PE indexed by sequence position, shared across batch) ---
    h = jnp.dot(xf, emb_w_ref[...], preferred_element_type=jnp.float32) + emb_b_ref[...]
    pe = pe_ref[:S, :]                                                    # (S, H)
    h = h.reshape(B, S, H) + pe[None, :, :]
    hf = h.reshape(B * S, H)                                              # (B*S, H)

    # --- encoder layers: statically unrolled, post-norm (PyTorch default), ReLU FFN ---
    for l in range(num_layers):
        # packed QKV projection: one (B*S, H) x (H, 128) MXU pass (lane-dense result)
        qkv = jnp.dot(hf, wqkv_ref[l], preferred_element_type=jnp.float32) + bqkv_ref[l]
        q = qkv[:, 0 * H:1 * H].reshape(B, S, H)
        k = qkv[:, 1 * H:2 * H].reshape(B, S, H)
        v = qkv[:, 2 * H:3 * H].reshape(B, S, H)

        # multi-head scaled-dot-product attention: static loop over heads,
        # each head batched over B via a leading-batch-dim einsum (no explicit k^T).
        heads = []
        for hh in range(num_heads):
            sl = slice(hh * hd, (hh + 1) * hd)
            qh = q[:, :, sl]                                              # (B, S, hd)
            kh = k[:, :, sl]
            vh = v[:, :, sl]
            s = jnp.einsum('bqd,bkd->bqk', qh, kh,
                           preferred_element_type=jnp.float32) * scale    # (B, S, S)
            s = s - jnp.max(s, axis=-1, keepdims=True)
            p = jnp.exp(s)
            p = p * pl.reciprocal(jnp.sum(p, axis=-1, keepdims=True), approx=True)
            heads.append(jnp.einsum('bqk,bkd->bqd', p, vh,
                                    preferred_element_type=jnp.float32))  # (B, S, hd)
        attn = jnp.concatenate(heads, axis=-1).reshape(B * S, H)
        attn = jnp.dot(attn, wo_ref[l], preferred_element_type=jnp.float32) + bo_ref[l]

        # residual + LayerNorm 1
        h1 = hf + attn
        mu1 = jnp.mean(h1, axis=-1, keepdims=True)
        var1 = jnp.mean((h1 - mu1) ** 2, axis=-1, keepdims=True)
        h1n = (h1 - mu1) * jax.lax.rsqrt(var1 + LN_EPS)
        h1n = h1n * ln1_w_ref[l] + ln1_b_ref[l]

        # feed-forward (ReLU), dim_feedforward == hidden_dim
        f = jnp.dot(h1n, w1_ref[l], preferred_element_type=jnp.float32) + b1_ref[l]
        f = jnp.maximum(f, 0.0)
        f = jnp.dot(f, w2_ref[l], preferred_element_type=jnp.float32) + b2_ref[l]

        # residual + LayerNorm 2
        h2 = h1n + f
        mu2 = jnp.mean(h2, axis=-1, keepdims=True)
        var2 = jnp.mean((h2 - mu2) ** 2, axis=-1, keepdims=True)
        h2n = (h2 - mu2) * jax.lax.rsqrt(var2 + LN_EPS)
        hf = h2n * ln2_w_ref[l] + ln2_b_ref[l]

    # --- mean over batch (== x.mean(dim=1) of the original (S, B, H) layout) + final fc ---
    pooled = jnp.mean(hf.reshape(B, S, H), axis=0)                        # (S, H)
    o_ref[...] = (jnp.dot(pooled, fc_w_ref[...],
                          preferred_element_type=jnp.float32) + fc_b_ref[...])


# --------------------------------------------------------------------------------
# parameter setup (deterministic, synthetic; QKV weights stored pre-packed per layer)
# --------------------------------------------------------------------------------
def make_positional_encoding(max_len, hidden_dim):
    position = jnp.arange(max_len, dtype=jnp.float32)[:, None]
    div_term = jnp.exp(jnp.arange(0, hidden_dim, 2, dtype=jnp.float32)
                       * (-math.log(10000.0) / hidden_dim))
    pe = jnp.zeros((max_len, hidden_dim), dtype=jnp.float32)
    pe = pe.at[:, 0::2].set(jnp.sin(position * div_term))
    pe = pe.at[:, 1::2].set(jnp.cos(position * div_term))
    return pe


def init_params(key):
    def nrm(k, shape, scale=0.1):
        return scale * jax.random.normal(k, shape, dtype=jnp.float32)

    keys = jax.random.split(key, 4 + NUM_LAYERS)
    params = {
        "emb_w": nrm(keys[0], (INPUT_DIM, HIDDEN_DIM)),
        "emb_b": nrm(keys[1], (1, HIDDEN_DIM)),
        "fc_w": nrm(keys[2], (HIDDEN_DIM, OUTPUT_DIM)),
        "fc_b": nrm(keys[3], (1, OUTPUT_DIM)),
        "pe": make_positional_encoding(MAX_LEN, HIDDEN_DIM),
    }

    wqkv, bqkv, wo, bo = [], [], [], []
    ln1w, ln1b, w1, b1, w2, b2, ln2w, ln2b = [], [], [], [], [], [], [], []
    H = HIDDEN_DIM
    for li in range(NUM_LAYERS):
        lk = jax.random.split(keys[4 + li], 12)
        wq, bq = nrm(lk[0], (H, H)), nrm(lk[1], (1, H))
        wk, bk = nrm(lk[2], (H, H)), nrm(lk[3], (1, H))
        wv, bv = nrm(lk[4], (H, H)), nrm(lk[5], (1, H))
        # Pack Q|K|V along the lane axis and zero-pad to a full 128-lane slab (done once at init).
        w_p = jnp.zeros((H, QKV_COLS), jnp.float32)
        w_p = w_p.at[:, 0 * H:1 * H].set(wq)
        w_p = w_p.at[:, 1 * H:2 * H].set(wk)
        w_p = w_p.at[:, 2 * H:3 * H].set(wv)
        b_p = jnp.zeros((1, QKV_COLS), jnp.float32)
        b_p = b_p.at[:, 0 * H:1 * H].set(bq)
        b_p = b_p.at[:, 1 * H:2 * H].set(bk)
        b_p = b_p.at[:, 2 * H:3 * H].set(bv)
        wqkv.append(w_p); bqkv.append(b_p)
        wo.append(nrm(lk[6], (H, H))); bo.append(nrm(lk[7], (1, H)))
        ln1w.append(jnp.ones((1, H), jnp.float32)); ln1b.append(jnp.zeros((1, H), jnp.float32))
        w1.append(nrm(lk[8], (H, H))); b1.append(nrm(lk[9], (1, H)))     # dim_feedforward == hidden_dim
        w2.append(nrm(lk[10], (H, H))); b2.append(nrm(lk[11], (1, H)))
        ln2w.append(jnp.ones((1, H), jnp.float32)); ln2b.append(jnp.zeros((1, H), jnp.float32))

    params.update({
        "wqkv": jnp.stack(wqkv), "bqkv": jnp.stack(bqkv),
        "wo": jnp.stack(wo), "bo": jnp.stack(bo),
        "ln1_w": jnp.stack(ln1w), "ln1_b": jnp.stack(ln1b),
        "w1": jnp.stack(w1), "b1": jnp.stack(b1),
        "w2": jnp.stack(w2), "b2": jnp.stack(b2),
        "ln2_w": jnp.stack(ln2w), "ln2_b": jnp.stack(ln2b),
    })
    return params


# --------------------------------------------------------------------------------
# forward pass: exactly ONE pallas_call, no wrapper ops (no transpose / pad / slice)
# --------------------------------------------------------------------------------
def transformer_forward(params, x):
    """x: (seq, batch, input_dim) -> (seq, output_dim), matching the PyTorch forward."""
    S, B, D = x.shape
    kernel = functools.partial(transformer_kernel,
                               num_heads=NUM_HEADS, num_layers=NUM_LAYERS)
    args = (x, params["pe"],
            params["emb_w"], params["emb_b"],
            params["wqkv"], params["bqkv"], params["wo"], params["bo"],
            params["ln1_w"], params["ln1_b"],
            params["w1"], params["b1"], params["w2"], params["b2"],
            params["ln2_w"], params["ln2_b"],
            params["fc_w"], params["fc_b"])
    return pl.pallas_call(
        kernel,
        out_shape=jax.ShapeDtypeStruct((S, OUTPUT_DIM), jnp.float32),
        in_specs=[pl.BlockSpec(memory_space=pltpu.MemorySpace.VMEM) for _ in args],
        out_specs=pl.BlockSpec(memory_space=pltpu.MemorySpace.VMEM),
    )(*args)


if __name__ == "__main__":
    key = jax.random.PRNGKey(0)
    pkey, xkey = jax.random.split(key)

    params = init_params(pkey)
    # PyTorch seq-first input: (seq, batch, input_dim)
    x = jax.random.normal(xkey, (SEQ_LEN, BATCH, INPUT_DIM), dtype=jnp.float32)

    out = jax.jit(transformer_forward)(params, x)
    out = jax.block_until_ready(out)

    assert out.shape == (SEQ_LEN, OUTPUT_DIM), out.shape
    assert bool(jnp.all(jnp.isfinite(out)))
    print("KERNEL_OK")
</pallas_src>

<mosaic_0001>
module attributes {stable_mosaic.version = 11 : i64} {
  func.func @transformer_kernel(%arg0: memref<8x2x16xf32, #tpu.memory_space<vmem>>, %arg1: memref<256x32xf32, #tpu.memory_space<vmem>>, %arg2: memref<16x32xf32, #tpu.memory_space<vmem>>, %arg3: memref<1x32xf32, #tpu.memory_space<vmem>>, %arg4: memref<2x32x128xf32, #tpu.memory_space<vmem>>, %arg5: memref<2x1x128xf32, #tpu.memory_space<vmem>>, %arg6: memref<2x32x32xf32, #tpu.memory_space<vmem>>, %arg7: memref<2x1x32xf32, #tpu.memory_space<vmem>>, %arg8: memref<2x1x32xf32, #tpu.memory_space<vmem>>, %arg9: memref<2x1x32xf32, #tpu.memory_space<vmem>>, %arg10: memref<2x32x32xf32, #tpu.memory_space<vmem>>, %arg11: memref<2x1x32xf32, #tpu.memory_space<vmem>>, %arg12: memref<2x32x32xf32, #tpu.memory_space<vmem>>, %arg13: memref<2x1x32xf32, #tpu.memory_space<vmem>>, %arg14: memref<2x1x32xf32, #tpu.memory_space<vmem>>, %arg15: memref<2x1x32xf32, #tpu.memory_space<vmem>>, %arg16: memref<32x8xf32, #tpu.memory_space<vmem>>, %arg17: memref<1x8xf32, #tpu.memory_space<vmem>>, %arg18: memref<8x8xf32, #tpu.memory_space<vmem>>) attributes {dimension_semantics = [], scalar_prefetch = 0 : i64, scratch_operands = 0 : i64, tpu.core_type = #tpu.core_type<tc>} {
    %c0 = arith.constant 0 : index
    %c0_0 = arith.constant 0 : index
    %c0_1 = arith.constant 0 : index
    %0 = vector.load %arg0[%c0, %c0_0, %c0_1] : memref<8x2x16xf32, #tpu.memory_space<vmem>>, vector<8x2x16xf32>
    %1 = vector.extract_strided_slice %0 {offsets = [0, 0, 0], sizes = [8, 1, 16], strides = [1, 1, 1]} : vector<8x2x16xf32> to vector<8x1x16xf32>
    %2 = vector.shape_cast %1 : vector<8x1x16xf32> to vector<8x16xf32>
    %3 = vector.extract_strided_slice %0 {offsets = [0, 1, 0], sizes = [8, 1, 16], strides = [1, 1, 1]} : vector<8x2x16xf32> to vector<8x1x16xf32>
    %4 = vector.shape_cast %3 : vector<8x1x16xf32> to vector<8x16xf32>
    %5 = tpu.concatenate %2, %4 in 0 : vector<8x16xf32>, vector<8x16xf32> -> vector<16x16xf32>
    %c0_2 = arith.constant 0 : index
    %c0_3 = arith.constant 0 : index
    %6 = vector.load %arg2[%c0_2, %c0_3] : memref<16x32xf32, #tpu.memory_space<vmem>>, vector<16x32xf32>
    %cst = arith.constant dense<0.000000e+00> : vector<16x32xf32>
    %7 = tpu.matmul %5, %6, %cst {dimension_numbers = #tpu.dot_dimension_numbers<[1], [0], [0], [1], [0, 0, 1, 1], [], []>} : vector<16x16xf32>, vector<16x32xf32>, vector<16x32xf32> -> vector<16x32xf32>
    %c0_4 = arith.constant 0 : index
    %c0_5 = arith.constant 0 : index
    %8 = vector.load %arg3[%c0_4, %c0_5] : memref<1x32xf32, #tpu.memory_space<vmem>>, vector<1x32xf32>
    %9 = vector.broadcast %8 : vector<1x32xf32> to vector<16x32xf32>
    %10 = arith.addf %7, %9 : vector<16x32xf32>
    %c0_6 = arith.constant 0 : index
    %c0_7 = arith.constant 0 : index
    %11 = vector.load %arg1[%c0_6, %c0_7] : memref<256x32xf32, #tpu.memory_space<vmem>>, vector<8x32xf32>
    %12 = vector.shape_cast %10 : vector<16x32xf32> to vector<2x8x32xf32>
    %13 = vector.shape_cast %11 : vector<8x32xf32> to vector<1x8x32xf32>
    %14 = vector.broadcast %13 : vector<1x8x32xf32> to vector<2x8x32xf32>
    %15 = arith.addf %12, %14 : vector<2x8x32xf32>
    %16 = vector.shape_cast %15 : vector<2x8x32xf32> to vector<16x32xf32>
    %c0_8 = arith.constant 0 : index
    %c0_9 = arith.constant 0 : index
    %c0_10 = arith.constant 0 : index
    %17 = vector.load %arg4[%c0_8, %c0_9, %c0_10] : memref<2x32x128xf32, #tpu.memory_space<vmem>>, vector<1x32x128xf32>
    %18 = vector.shape_cast %17 : vector<1x32x128xf32> to vector<32x128xf32>
    %cst_11 = arith.constant dense<0.000000e+00> : vector<16x128xf32>
    %19 = tpu.matmul %16, %18, %cst_11 {dimension_numbers = #tpu.dot_dimension_numbers<[1], [0], [0], [1], [0, 0, 1, 1], [], []>} : vector<16x32xf32>, vector<32x128xf32>, vector<16x128xf32> -> vector<16x128xf32>
    %c0_12 = arith.constant 0 : index
    %c0_13 = arith.constant 0 : index
    %c0_14 = arith.constant 0 : index
    %20 = vector.load %arg5[%c0_12, %c0_13, %c0_14] : memref<2x1x128xf32, #tpu.memory_space<vmem>>, vector<1x1x128xf32>
    %21 = vector.shape_cast %20 : vector<1x1x128xf32> to vector<1x128xf32>
    %22 = vector.broadcast %21 : vector<1x128xf32> to vector<16x128xf32>
    %23 = arith.addf %19, %22 : vector<16x128xf32>
    %24 = vector.extract_strided_slice %23 {offsets = [0, 0], sizes = [16, 32], strides = [1, 1]} : vector<16x128xf32> to vector<16x32xf32>
    %25 = vector.shape_cast %24 : vector<16x32xf32> to vector<2x8x32xf32>
    %26 = vector.extract_strided_slice %23 {offsets = [0, 32], sizes = [16, 32], strides = [1, 1]} : vector<16x128xf32> to vector<16x32xf32>
    %27 = vector.shape_cast %26 : vector<16x32xf32> to vector<2x8x32xf32>
    %28 = vector.extract_strided_slice %23 {offsets = [0, 64], sizes = [16, 32], strides = [1, 1]} : vector<16x128xf32> to vector<16x32xf32>
    %29 = vector.shape_cast %28 : vector<16x32xf32> to vector<2x8x32xf32>
    %30 = vector.extract_strided_slice %25 {offsets = [0, 0, 0], sizes = [2, 8, 8], strides = [1, 1, 1]} : vector<2x8x32xf32> to vector<2x8x8xf32>
    %31 = vector.extract_strided_slice %27 {offsets = [0, 0, 0], sizes = [2, 8, 8], strides = [1, 1, 1]} : vector<2x8x32xf32> to vector<2x8x8xf32>
    %32 = vector.extract_strided_slice %29 {offsets = [0, 0, 0], sizes = [2, 8, 8], strides = [1, 1, 1]} : vector<2x8x32xf32> to vector<2x8x8xf32>
    "tpu.trace_start"() <{level = 10 : i32, message = "bqd,bkd->bqk"}> : () -> ()
    %cst_15 = arith.constant dense<0.000000e+00> : vector<2x8x8xf32>
    %33 = tpu.matmul %30, %31, %cst_15 {dimension_numbers = #tpu.dot_dimension_numbers<[2], [2], [1], [1], [0, 0, 0, 1, 1, 1], [0], [0]>} : vector<2x8x8xf32>, vector<2x8x8xf32>, vector<2x8x8xf32> -> vector<2x8x8xf32>
    "tpu.trace_stop"() : () -> ()
    %cst_16 = arith.constant 0.353553385 : f32
    %34 = vector.broadcast %cst_16 : f32 to vector<2x8x8xf32>
    %35 = arith.mulf %33, %34 : vector<2x8x8xf32>
    %cst_17 = arith.constant dense<0xFF800000> : vector<2x8xf32>
    %36 = vector.multi_reduction <maximumf>, %35, %cst_17 [2] : vector<2x8x8xf32> to vector<2x8xf32>
    %37 = vector.shape_cast %36 : vector<2x8xf32> to vector<2x8x1xf32>
    %38 = vector.broadcast %37 : vector<2x8x1xf32> to vector<2x8x8xf32>
    %39 = arith.subf %35, %38 : vector<2x8x8xf32>
    %40 = math.exp %39 : vector<2x8x8xf32>
    %cst_18 = arith.constant dense<0.000000e+00> : vector<2x8xf32>
    %41 = vector.multi_reduction <add>, %40, %cst_18 [2] : vector<2x8x8xf32> to vector<2x8xf32>
    %42 = vector.shape_cast %41 : vector<2x8xf32> to vector<2x8x1xf32>
    %43 = tpu.reciprocal %42 {approx = true} : vector<2x8x1xf32> -> vector<2x8x1xf32>
    %44 = vector.broadcast %43 : vector<2x8x1xf32> to vector<2x8x8xf32>
    %45 = arith.mulf %40, %44 : vector<2x8x8xf32>
    "tpu.trace_start"() <{level = 10 : i32, message = "bqk,bkd->bqd"}> : () -> ()
    %cst_19 = arith.constant dense<0.000000e+00> : vector<2x8x8xf32>
    %46 = tpu.matmul %45, %32, %cst_19 {dimension_numbers = #tpu.dot_dimension_numbers<[2], [1], [1], [2], [0, 0, 0, 1, 1, 2], [0], [0]>} : vector<2x8x8xf32>, vector<2x8x8xf32>, vector<2x8x8xf32> -> vector<2x8x8xf32>
    "tpu.trace_stop"() : () -> ()
    %47 = vector.extract_strided_slice %25 {offsets = [0, 0, 8], sizes = [2, 8, 8], strides = [1, 1, 1]} : vector<2x8x32xf32> to vector<2x8x8xf32>
    %48 = vector.extract_strided_slice %27 {offsets = [0, 0, 8], sizes = [2, 8, 8], strides = [1, 1, 1]} : vector<2x8x32xf32> to vector<2x8x8xf32>
    %49 = vector.extract_strided_slice %29 {offsets = [0, 0, 8], sizes = [2, 8, 8], strides = [1, 1, 1]} : vector<2x8x32xf32> to vector<2x8x8xf32>
    "tpu.trace_start"() <{level = 10 : i32, message = "bqd,bkd->bqk"}> : () -> ()
    %cst_20 = arith.constant dense<0.000000e+00> : vector<2x8x8xf32>
    %50 = tpu.matmul %47, %48, %cst_20 {dimension_numbers = #tpu.dot_dimension_numbers<[2], [2], [1], [1], [0, 0, 0, 1, 1, 1], [0], [0]>} : vector<2x8x8xf32>, vector<2x8x8xf32>, vector<2x8x8xf32> -> vector<2x8x8xf32>
    "tpu.trace_stop"() : () -> ()
    %cst_21 = arith.constant 0.353553385 : f32
    %51 = vector.broadcast %cst_21 : f32 to vector<2x8x8xf32>
    %52 = arith.mulf %50, %51 : vector<2x8x8xf32>
    %cst_22 = arith.constant dense<0xFF800000> : vector<2x8xf32>
    %53 = vector.multi_reduction <maximumf>, %52, %cst_22 [2] : vector<2x8x8xf32> to vector<2x8xf32>
    %54 = vector.shape_cast %53 : vector<2x8xf32> to vector<2x8x1xf32>
    %55 = vector.broadcast %54 : vector<2x8x1xf32> to vector<2x8x8xf32>
    %56 = arith.subf %52, %55 : vector<2x8x8xf32>
    %57 = math.exp %56 : vector<2x8x8xf32>
    %cst_23 = arith.constant dense<0.000000e+00> : vector<2x8xf32>
    %58 = vector.multi_reduction <add>, %57, %cst_23 [2] : vector<2x8x8xf32> to vector<2x8xf32>
    %59 = vector.shape_cast %58 : vector<2x8xf32> to vector<2x8x1xf32>
    %60 = tpu.reciprocal %59 {approx = true} : vector<2x8x1xf32> -> vector<2x8x1xf32>
    %61 = vector.broadcast %60 : vector<2x8x1xf32> to vector<2x8x8xf32>
    %62 = arith.mulf %57, %61 : vector<2x8x8xf32>
    "tpu.trace_start"() <{level = 10 : i32, message = "bqk,bkd->bqd"}> : () -> ()
    %cst_24 = arith.constant dense<0.000000e+00> : vector<2x8x8xf32>
    %63 = tpu.matmul %62, %49, %cst_24 {dimension_numbers = #tpu.dot_dimension_numbers<[2], [1], [1], [2], [0, 0, 0, 1, 1, 2], [0], [0]>} : vector<2x8x8xf32>, vector<2x8x8xf32>, vector<2x8x8xf32> -> vector<2x8x8xf32>
    "tpu.trace_stop"() : () -> ()
    %64 = vector.extract_strided_slice %25 {offsets = [0, 0, 16], sizes = [2, 8, 8], strides = [1, 1, 1]} : vector<2x8x32xf32> to vector<2x8x8xf32>
    %65 = vector.extract_strided_slice %27 {offsets = [0, 0, 16], sizes = [2, 8, 8], strides = [1, 1, 1]} : vector<2x8x32xf32> to vector<2x8x8xf32>
    %66 = vector.extract_strided_slice %29 {offsets = [0, 0, 16], sizes = [2, 8, 8], strides = [1, 1, 1]} : vector<2x8x32xf32> to vector<2x8x8xf32>
    "tpu.trace_start"() <{level = 10 : i32, message = "bqd,bkd->bqk"}> : () -> ()
    %cst_25 = arith.constant dense<0.000000e+00> : vector<2x8x8xf32>
    %67 = tpu.matmul %64, %65, %cst_25 {dimension_numbers = #tpu.dot_dimension_numbers<[2], [2], [1], [1], [0, 0, 0, 1, 1, 1], [0], [0]>} : vector<2x8x8xf32>, vector<2x8x8xf32>, vector<2x8x8xf32> -> vector<2x8x8xf32>
    "tpu.trace_stop"() : () -> ()
    %cst_26 = arith.constant 0.353553385 : f32
    %68 = vector.broadcast %cst_26 : f32 to vector<2x8x8xf32>
    %69 = arith.mulf %67, %68 : vector<2x8x8xf32>
    %cst_27 = arith.constant dense<0xFF800000> : vector<2x8xf32>
    %70 = vector.multi_reduction <maximumf>, %69, %cst_27 [2] : vector<2x8x8xf32> to vector<2x8xf32>
    %71 = vector.shape_cast %70 : vector<2x8xf32> to vector<2x8x1xf32>
    %72 = vector.broadcast %71 : vector<2x8x1xf32> to vector<2x8x8xf32>
    %73 = arith.subf %69, %72 : vector<2x8x8xf32>
    %74 = math.exp %73 : vector<2x8x8xf32>
    %cst_28 = arith.constant dense<0.000000e+00> : vector<2x8xf32>
    %75 = vector.multi_reduction <add>, %74, %cst_28 [2] : vector<2x8x8xf32> to vector<2x8xf32>
    %76 = vector.shape_cast %75 : vector<2x8xf32> to vector<2x8x1xf32>
    %77 = tpu.reciprocal %76 {approx = true} : vector<2x8x1xf32> -> vector<2x8x1xf32>
    %78 = vector.broadcast %77 : vector<2x8x1xf32> to vector<2x8x8xf32>
    %79 = arith.mulf %74, %78 : vector<2x8x8xf32>
    "tpu.trace_start"() <{level = 10 : i32, message = "bqk,bkd->bqd"}> : () -> ()
    %cst_29 = arith.constant dense<0.000000e+00> : vector<2x8x8xf32>
    %80 = tpu.matmul %79, %66, %cst_29 {dimension_numbers = #tpu.dot_dimension_numbers<[2], [1], [1], [2], [0, 0, 0, 1, 1, 2], [0], [0]>} : vector<2x8x8xf32>, vector<2x8x8xf32>, vector<2x8x8xf32> -> vector<2x8x8xf32>
    "tpu.trace_stop"() : () -> ()
    %81 = vector.extract_strided_slice %25 {offsets = [0, 0, 24], sizes = [2, 8, 8], strides = [1, 1, 1]} : vector<2x8x32xf32> to vector<2x8x8xf32>
    %82 = vector.extract_strided_slice %27 {offsets = [0, 0, 24], sizes = [2, 8, 8], strides = [1, 1, 1]} : vector<2x8x32xf32> to vector<2x8x8xf32>
    %83 = vector.extract_strided_slice %29 {offsets = [0, 0, 24], sizes = [2, 8, 8], strides = [1, 1, 1]} : vector<2x8x32xf32> to vector<2x8x8xf32>
    "tpu.trace_start"() <{level = 10 : i32, message = "bqd,bkd->bqk"}> : () -> ()
    %cst_30 = arith.constant dense<0.000000e+00> : vector<2x8x8xf32>
    %84 = tpu.matmul %81, %82, %cst_30 {dimension_numbers = #tpu.dot_dimension_numbers<[2], [2], [1], [1], [0, 0, 0, 1, 1, 1], [0], [0]>} : vector<2x8x8xf32>, vector<2x8x8xf32>, vector<2x8x8xf32> -> vector<2x8x8xf32>
    "tpu.trace_stop"() : () -> ()
    %cst_31 = arith.constant 0.353553385 : f32
    %85 = vector.broadcast %cst_31 : f32 to vector<2x8x8xf32>
    %86 = arith.mulf %84, %85 : vector<2x8x8xf32>
    %cst_32 = arith.constant dense<0xFF800000> : vector<2x8xf32>
    %87 = vector.multi_reduction <maximumf>, %86, %cst_32 [2] : vector<2x8x8xf32> to vector<2x8xf32>
    %88 = vector.shape_cast %87 : vector<2x8xf32> to vector<2x8x1xf32>
    %89 = vector.broadcast %88 : vector<2x8x1xf32> to vector<2x8x8xf32>
    %90 = arith.subf %86, %89 : vector<2x8x8xf32>
    %91 = math.exp %90 : vector<2x8x8xf32>
    %cst_33 = arith.constant dense<0.000000e+00> : vector<2x8xf32>
    %92 = vector.multi_reduction <add>, %91, %cst_33 [2] : vector<2x8x8xf32> to vector<2x8xf32>
    %93 = vector.shape_cast %92 : vector<2x8xf32> to vector<2x8x1xf32>
    %94 = tpu.reciprocal %93 {approx = true} : vector<2x8x1xf32> -> vector<2x8x1xf32>
    %95 = vector.broadcast %94 : vector<2x8x1xf32> to vector<2x8x8xf32>
    %96 = arith.mulf %91, %95 : vector<2x8x8xf32>
    "tpu.trace_start"() <{level = 10 : i32, message = "bqk,bkd->bqd"}> : () -> ()
    %cst_34 = arith.constant dense<0.000000e+00> : vector<2x8x8xf32>
    %97 = tpu.matmul %96, %83, %cst_34 {dimension_numbers = #tpu.dot_dimension_numbers<[2], [1], [1], [2], [0, 0, 0, 1, 1, 2], [0], [0]>} : vector<2x8x8xf32>, vector<2x8x8xf32>, vector<2x8x8xf32> -> vector<2x8x8xf32>
    "tpu.trace_stop"() : () -> ()
    %98 = tpu.concatenate %46, %63, %80, %97 in 2 : vector<2x8x8xf32>, vector<2x8x8xf32>, vector<2x8x8xf32>, vector<2x8x8xf32> -> vector<2x8x32xf32>
    %99 = vector.shape_cast %98 : vector<2x8x32xf32> to vector<16x32xf32>
    %c0_35 = arith.constant 0 : index
    %c0_36 = arith.constant 0 : index
    %c0_37 = arith.constant 0 : index
    %100 = vector.load %arg6[%c0_35, %c0_36, %c0_37] : memref<2x32x32xf32, #tpu.memory_space<vmem>>, vector<1x32x32xf32>
    %101 = vector.shape_cast %100 : vector<1x32x32xf32> to vector<32x32xf32>
    %cst_38 = arith.constant dense<0.000000e+00> : vector<16x32xf32>
    %102 = tpu.matmul %99, %101, %cst_38 {dimension_numbers = #tpu.dot_dimension_numbers<[1], [0], [0], [1], [0, 0, 1, 1], [], []>} : vector<16x32xf32>, vector<32x32xf32>, vector<16x32xf32> -> vector<16x32xf32>
    %c0_39 = arith.constant 0 : index
    %c0_40 = arith.constant 0 : index
    %c0_41 = arith.constant 0 : index
    %103 = vector.load %arg7[%c0_39, %c0_40, %c0_41] : memref<2x1x32xf32, #tpu.memory_space<vmem>>, vector<1x1x32xf32>
    %104 = vector.shape_cast %103 : vector<1x1x32xf32> to vector<1x32xf32>
    %105 = vector.broadcast %104 : vector<1x32xf32> to vector<16x32xf32>
    %106 = arith.addf %102, %105 : vector<16x32xf32>
    %107 = arith.addf %16, %106 : vector<16x32xf32>
    %cst_42 = arith.constant dense<0.000000e+00> : vector<16xf32>
    %108 = vector.multi_reduction <add>, %107, %cst_42 [1] : vector<16x32xf32> to vector<16xf32>
    %109 = vector.shape_cast %108 : vector<16xf32> to vector<16x1xf32>
    %cst_43 = arith.constant 3.200000e+01 : f32
    %110 = vector.broadcast %cst_43 : f32 to vector<16x1xf32>
    %111 = arith.divf %109, %110 : vector<16x1xf32>
    %112 = vector.broadcast %111 : vector<16x1xf32> to vector<16x32xf32>
    %113 = arith.subf %107, %112 : vector<16x32xf32>
    %114 = arith.mulf %113, %113 : vector<16x32xf32>
    %cst_44 = arith.constant dense<0.000000e+00> : vector<16xf32>
    %115 = vector.multi_reduction <add>, %114, %cst_44 [1] : vector<16x32xf32> to vector<16xf32>
    %116 = vector.shape_cast %115 : vector<16xf32> to vector<16x1xf32>
    %cst_45 = arith.constant 3.200000e+01 : f32
    %117 = vector.broadcast %cst_45 : f32 to vector<16x1xf32>
    %118 = arith.divf %116, %117 : vector<16x1xf32>
    %119 = vector.broadcast %111 : vector<16x1xf32> to vector<16x32xf32>
    %120 = arith.subf %107, %119 : vector<16x32xf32>
    %cst_46 = arith.constant 9.99999974E-6 : f32
    %121 = vector.broadcast %cst_46 : f32 to vector<16x1xf32>
    %122 = arith.addf %118, %121 : vector<16x1xf32>
    %123 = math.rsqrt %122 : vector<16x1xf32>
    %124 = vector.broadcast %123 : vector<16x1xf32> to vector<16x32xf32>
    %125 = arith.mulf %120, %124 : vector<16x32xf32>
    %c0_47 = arith.constant 0 : index
    %c0_48 = arith.constant 0 : index
    %c0_49 = arith.constant 0 : index
    %126 = vector.load %arg8[%c0_47, %c0_48, %c0_49] : memref<2x1x32xf32, #tpu.memory_space<vmem>>, vector<1x1x32xf32>
    %127 = vector.shape_cast %126 : vector<1x1x32xf32> to vector<1x32xf32>
    %128 = vector.broadcast %127 : vector<1x32xf32> to vector<16x32xf32>
    %129 = arith.mulf %125, %128 : vector<16x32xf32>
    %c0_50 = arith.constant 0 : index
    %c0_51 = arith.constant 0 : index
    %c0_52 = arith.constant 0 : index
    %130 = vector.load %arg9[%c0_50, %c0_51, %c0_52] : memref<2x1x32xf32, #tpu.memory_space<vmem>>, vector<1x1x32xf32>
    %131 = vector.shape_cast %130 : vector<1x1x32xf32> to vector<1x32xf32>
    %132 = vector.broadcast %131 : vector<1x32xf32> to vector<16x32xf32>
    %133 = arith.addf %129, %132 : vector<16x32xf32>
    %c0_53 = arith.constant 0 : index
    %c0_54 = arith.constant 0 : index
    %c0_55 = arith.constant 0 : index
    %134 = vector.load %arg10[%c0_53, %c0_54, %c0_55] : memref<2x32x32xf32, #tpu.memory_space<vmem>>, vector<1x32x32xf32>
    %135 = vector.shape_cast %134 : vector<1x32x32xf32> to vector<32x32xf32>
    %cst_56 = arith.constant dense<0.000000e+00> : vector<16x32xf32>
    %136 = tpu.matmul %133, %135, %cst_56 {dimension_numbers = #tpu.dot_dimension_numbers<[1], [0], [0], [1], [0, 0, 1, 1], [], []>} : vector<16x32xf32>, vector<32x32xf32>, vector<16x32xf32> -> vector<16x32xf32>
    %c0_57 = arith.constant 0 : index
    %c0_58 = arith.constant 0 : index
    %c0_59 = arith.constant 0 : index
    %137 = vector.load %arg11[%c0_57, %c0_58, %c0_59] : memref<2x1x32xf32, #tpu.memory_space<vmem>>, vector<1x1x32xf32>
    %138 = vector.shape_cast %137 : vector<1x1x32xf32> to vector<1x32xf32>
    %139 = vector.broadcast %138 : vector<1x32xf32> to vector<16x32xf32>
    %140 = arith.addf %136, %139 : vector<16x32xf32>
    %cst_60 = arith.constant 0.000000e+00 : f32
    %141 = vector.broadcast %cst_60 : f32 to vector<16x32xf32>
    %142 = arith.maximumf %140, %141 : vector<16x32xf32>
    %c0_61 = arith.constant 0 : index
    %c0_62 = arith.constant 0 : index
    %c0_63 = arith.constant 0 : index
    %143 = vector.load %arg12[%c0_61, %c0_62, %c0_63] : memref<2x32x32xf32, #tpu.memory_space<vmem>>, vector<1x32x32xf32>
    %144 = vector.shape_cast %143 : vector<1x32x32xf32> to vector<32x32xf32>
    %cst_64 = arith.constant dense<0.000000e+00> : vector<16x32xf32>
    %145 = tpu.matmul %142, %144, %cst_64 {dimension_numbers = #tpu.dot_dimension_numbers<[1], [0], [0], [1], [0, 0, 1, 1], [], []>} : vector<16x32xf32>, vector<32x32xf32>, vector<16x32xf32> -> vector<16x32xf32>
    %c0_65 = arith.constant 0 : index
    %c0_66 = arith.constant 0 : index
    %c0_67 = arith.constant 0 : index
    %146 = vector.load %arg13[%c0_65, %c0_66, %c0_67] : memref<2x1x32xf32, #tpu.memory_space<vmem>>, vector<1x1x32xf32>
    %147 = vector.shape_cast %146 : vector<1x1x32xf32> to vector<1x32xf32>
    %148 = vector.broadcast %147 : vector<1x32xf32> to vector<16x32xf32>
    %149 = arith.addf %145, %148 : vector<16x32xf32>
    %150 = arith.addf %133, %149 : vector<16x32xf32>
    %cst_68 = arith.constant dense<0.000000e+00> : vector<16xf32>
    %151 = vector.multi_reduction <add>, %150, %cst_68 [1] : vector<16x32xf32> to vector<16xf32>
    %152 = vector.shape_cast %151 : vector<16xf32> to vector<16x1xf32>
    %cst_69 = arith.constant 3.200000e+01 : f32
    %153 = vector.broadcast %cst_69 : f32 to vector<16x1xf32>
    %154 = arith.divf %152, %153 : vector<16x1xf32>
    %155 = vector.broadcast %154 : vector<16x1xf32> to vector<16x32xf32>
    %156 = arith.subf %150, %155 : vector<16x32xf32>
    %157 = arith.mulf %156, %156 : vector<16x32xf32>
    %cst_70 = arith.constant dense<0.000000e+00> : vector<16xf32>
    %158 = vector.multi_reduction <add>, %157, %cst_70 [1] : vector<16x32xf32> to vector<16xf32>
    %159 = vector.shape_cast %158 : vector<16xf32> to vector<16x1xf32>
    %cst_71 = arith.constant 3.200000e+01 : f32
    %160 = vector.broadcast %cst_71 : f32 to vector<16x1xf32>
    %161 = arith.divf %159, %160 : vector<16x1xf32>
    %162 = vector.broadcast %154 : vector<16x1xf32> to vector<16x32xf32>
    %163 = arith.subf %150, %162 : vector<16x32xf32>
    %cst_72 = arith.constant 9.99999974E-6 : f32
    %164 = vector.broadcast %cst_72 : f32 to vector<16x1xf32>
    %165 = arith.addf %161, %164 : vector<16x1xf32>
    %166 = math.rsqrt %165 : vector<16x1xf32>
    %167 = vector.broadcast %166 : vector<16x1xf32> to vector<16x32xf32>
    %168 = arith.mulf %163, %167 : vector<16x32xf32>
    %c0_73 = arith.constant 0 : index
    %c0_74 = arith.constant 0 : index
    %c0_75 = arith.constant 0 : index
    %169 = vector.load %arg14[%c0_73, %c0_74, %c0_75] : memref<2x1x32xf32, #tpu.memory_space<vmem>>, vector<1x1x32xf32>
    %170 = vector.shape_cast %169 : vector<1x1x32xf32> to vector<1x32xf32>
    %171 = vector.broadcast %170 : vector<1x32xf32> to vector<16x32xf32>
    %172 = arith.mulf %168, %171 : vector<16x32xf32>
    %c0_76 = arith.constant 0 : index
    %c0_77 = arith.constant 0 : index
    %c0_78 = arith.constant 0 : index
    %173 = vector.load %arg15[%c0_76, %c0_77, %c0_78] : memref<2x1x32xf32, #tpu.memory_space<vmem>>, vector<1x1x32xf32>
    %174 = vector.shape_cast %173 : vector<1x1x32xf32> to vector<1x32xf32>
    %175 = vector.broadcast %174 : vector<1x32xf32> to vector<16x32xf32>
    %176 = arith.addf %172, %175 : vector<16x32xf32>
    %c1 = arith.constant 1 : index
    %c0_79 = arith.constant 0 : index
    %c0_80 = arith.constant 0 : index
    %177 = vector.load %arg4[%c1, %c0_79, %c0_80] : memref<2x32x128xf32, #tpu.memory_space<vmem>>, vector<1x32x128xf32>
    %178 = vector.shape_cast %177 : vector<1x32x128xf32> to vector<32x128xf32>
    %cst_81 = arith.constant dense<0.000000e+00> : vector<16x128xf32>
    %179 = tpu.matmul %176, %178, %cst_81 {dimension_numbers = #tpu.dot_dimension_numbers<[1], [0], [0], [1], [0, 0, 1, 1], [], []>} : vector<16x32xf32>, vector<32x128xf32>, vector<16x128xf32> -> vector<16x128xf32>
    %c1_82 = arith.constant 1 : index
    %c0_83 = arith.constant 0 : index
    %c0_84 = arith.constant 0 : index
    %180 = vector.load %arg5[%c1_82, %c0_83, %c0_84] : memref<2x1x128xf32, #tpu.memory_space<vmem>>, vector<1x1x128xf32>
    %181 = vector.shape_cast %180 : vector<1x1x128xf32> to vector<1x128xf32>
    %182 = vector.broadcast %181 : vector<1x128xf32> to vector<16x128xf32>
    %183 = arith.addf %179, %182 : vector<16x128xf32>
    %184 = vector.extract_strided_slice %183 {offsets = [0, 0], sizes = [16, 32], strides = [1, 1]} : vector<16x128xf32> to vector<16x32xf32>
    %185 = vector.shape_cast %184 : vector<16x32xf32> to vector<2x8x32xf32>
    %186 = vector.extract_strided_slice %183 {offsets = [0, 32], sizes = [16, 32], strides = [1, 1]} : vector<16x128xf32> to vector<16x32xf32>
    %187 = vector.shape_cast %186 : vector<16x32xf32> to vector<2x8x32xf32>
    %188 = vector.extract_strided_slice %183 {offsets = [0, 64], sizes = [16, 32], strides = [1, 1]} : vector<16x128xf32> to vector<16x32xf32>
    %189 = vector.shape_cast %188 : vector<16x32xf32> to vector<2x8x32xf32>
    %190 = vector.extract_strided_slice %185 {offsets = [0, 0, 0], sizes = [2, 8, 8], strides = [1, 1, 1]} : vector<2x8x32xf32> to vector<2x8x8xf32>
    %191 = vector.extract_strided_slice %187 {offsets = [0, 0, 0], sizes = [2, 8, 8], strides = [1, 1, 1]} : vector<2x8x32xf32> to vector<2x8x8xf32>
    %192 = vector.extract_strided_slice %189 {offsets = [0, 0, 0], sizes = [2, 8, 8], strides = [1, 1, 1]} : vector<2x8x32xf32> to vector<2x8x8xf32>
    "tpu.trace_start"() <{level = 10 : i32, message = "bqd,bkd->bqk"}> : () -> ()
    %cst_85 = arith.constant dense<0.000000e+00> : vector<2x8x8xf32>
    %193 = tpu.matmul %190, %191, %cst_85 {dimension_numbers = #tpu.dot_dimension_numbers<[2], [2], [1], [1], [0, 0, 0, 1, 1, 1], [0], [0]>} : vector<2x8x8xf32>, vector<2x8x8xf32>, vector<2x8x8xf32> -> vector<2x8x8xf32>
    "tpu.trace_stop"() : () -> ()
    %cst_86 = arith.constant 0.353553385 : f32
    %194 = vector.broadcast %cst_86 : f32 to vector<2x8x8xf32>
    %195 = arith.mulf %193, %194 : vector<2x8x8xf32>
    %cst_87 = arith.constant dense<0xFF800000> : vector<2x8xf32>
    %196 = vector.multi_reduction <maximumf>, %195, %cst_87 [2] : vector<2x8x8xf32> to vector<2x8xf32>
    %197 = vector.shape_cast %196 : vector<2x8xf32> to vector<2x8x1xf32>
    %198 = vector.broadcast %197 : vector<2x8x1xf32> to vector<2x8x8xf32>
    %199 = arith.subf %195, %198 : vector<2x8x8xf32>
    %200 = math.exp %199 : vector<2x8x8xf32>
    %cst_88 = arith.constant dense<0.000000e+00> : vector<2x8xf32>
    %201 = vector.multi_reduction <add>, %200, %cst_88 [2] : vector<2x8x8xf32> to vector<2x8xf32>
    %202 = vector.shape_cast %201 : vector<2x8xf32> to vector<2x8x1xf32>
    %203 = tpu.reciprocal %202 {approx = true} : vector<2x8x1xf32> -> vector<2x8x1xf32>
    %204 = vector.broadcast %203 : vector<2x8x1xf32> to vector<2x8x8xf32>
    %205 = arith.mulf %200, %204 : vector<2x8x8xf32>
    "tpu.trace_start"() <{level = 10 : i32, message = "bqk,bkd->bqd"}> : () -> ()
    %cst_89 = arith.constant dense<0.000000e+00> : vector<2x8x8xf32>
    %206 = tpu.matmul %205, %192, %cst_89 {dimension_numbers = #tpu.dot_dimension_numbers<[2], [1], [1], [2], [0, 0, 0, 1, 1, 2], [0], [0]>} : vector<2x8x8xf32>, vector<2x8x8xf32>, vector<2x8x8xf32> -> vector<2x8x8xf32>
    "tpu.trace_stop"() : () -> ()
    %207 = vector.extract_strided_slice %185 {offsets = [0, 0, 8], sizes = [2, 8, 8], strides = [1, 1, 1]} : vector<2x8x32xf32> to vector<2x8x8xf32>
    %208 = vector.extract_strided_slice %187 {offsets = [0, 0, 8], sizes = [2, 8, 8], strides = [1, 1, 1]} : vector<2x8x32xf32> to vector<2x8x8xf32>
    %209 = vector.extract_strided_slice %189 {offsets = [0, 0, 8], sizes = [2, 8, 8], strides = [1, 1, 1]} : vector<2x8x32xf32> to vector<2x8x8xf32>
    "tpu.trace_start"() <{level = 10 : i32, message = "bqd,bkd->bqk"}> : () -> ()
    %cst_90 = arith.constant dense<0.000000e+00> : vector<2x8x8xf32>
    %210 = tpu.matmul %207, %208, %cst_90 {dimension_numbers = #tpu.dot_dimension_numbers<[2], [2], [1], [1], [0, 0, 0, 1, 1, 1], [0], [0]>} : vector<2x8x8xf32>, vector<2x8x8xf32>, vector<2x8x8xf32> -> vector<2x8x8xf32>
    "tpu.trace_stop"() : () -> ()
    %cst_91 = arith.constant 0.353553385 : f32
    %211 = vector.broadcast %cst_91 : f32 to vector<2x8x8xf32>
    %212 = arith.mulf %210, %211 : vector<2x8x8xf32>
    %cst_92 = arith.constant dense<0xFF800000> : vector<2x8xf32>
    %213 = vector.multi_reduction <maximumf>, %212, %cst_92 [2] : vector<2x8x8xf32> to vector<2x8xf32>
    %214 = vector.shape_cast %213 : vector<2x8xf32> to vector<2x8x1xf32>
    %215 = vector.broadcast %214 : vector<2x8x1xf32> to vector<2x8x8xf32>
    %216 = arith.subf %212, %215 : vector<2x8x8xf32>
    %217 = math.exp %216 : vector<2x8x8xf32>
    %cst_93 = arith.constant dense<0.000000e+00> : vector<2x8xf32>
    %218 = vector.multi_reduction <add>, %217, %cst_93 [2] : vector<2x8x8xf32> to vector<2x8xf32>
    %219 = vector.shape_cast %218 : vector<2x8xf32> to vector<2x8x1xf32>
    %220 = tpu.reciprocal %219 {approx = true} : vector<2x8x1xf32> -> vector<2x8x1xf32>
    %221 = vector.broadcast %220 : vector<2x8x1xf32> to vector<2x8x8xf32>
    %222 = arith.mulf %217, %221 : vector<2x8x8xf32>
    "tpu.trace_start"() <{level = 10 : i32, message = "bqk,bkd->bqd"}> : () -> ()
    %cst_94 = arith.constant dense<0.000000e+00> : vector<2x8x8xf32>
    %223 = tpu.matmul %222, %209, %cst_94 {dimension_numbers = #tpu.dot_dimension_numbers<[2], [1], [1], [2], [0, 0, 0, 1, 1, 2], [0], [0]>} : vector<2x8x8xf32>, vector<2x8x8xf32>, vector<2x8x8xf32> -> vector<2x8x8xf32>
    "tpu.trace_stop"() : () -> ()
    %224 = vector.extract_strided_slice %185 {offsets = [0, 0, 16], sizes = [2, 8, 8], strides = [1, 1, 1]} : vector<2x8x32xf32> to vector<2x8x8xf32>
    %225 = vector.extract_strided_slice %187 {offsets = [0, 0, 16], sizes = [2, 8, 8], strides = [1, 1, 1]} : vector<2x8x32xf32> to vector<2x8x8xf32>
    %226 = vector.extract_strided_slice %189 {offsets = [0, 0, 16], sizes = [2, 8, 8], strides = [1, 1, 1]} : vector<2x8x32xf32> to vector<2x8x8xf32>
    "tpu.trace_start"() <{level = 10 : i32, message = "bqd,bkd->bqk"}> : () -> ()
    %cst_95 = arith.constant dense<0.000000e+00> : vector<2x8x8xf32>
    %227 = tpu.matmul %224, %225, %cst_95 {dimension_numbers = #tpu.dot_dimension_numbers<[2], [2], [1], [1], [0, 0, 0, 1, 1, 1], [0], [0]>} : vector<2x8x8xf32>, vector<2x8x8xf32>, vector<2x8x8xf32> -> vector<2x8x8xf32>
    "tpu.trace_stop"() : () -> ()
    %cst_96 = arith.constant 0.353553385 : f32
    %228 = vector.broadcast %cst_96 : f32 to vector<2x8x8xf32>
    %229 = arith.mulf %227, %228 : vector<2x8x8xf32>
    %cst_97 = arith.constant dense<0xFF800000> : vector<2x8xf32>
    %230 = vector.multi_reduction <maximumf>, %229, %cst_97 [2] : vector<2x8x8xf32> to vector<2x8xf32>
    %231 = vector.shape_cast %230 : vector<2x8xf32> to vector<2x8x1xf32>
    %232 = vector.broadcast %231 : vector<2x8x1xf32> to vector<2x8x8xf32>
    %233 = arith.subf %229, %232 : vector<2x8x8xf32>
    %234 = math.exp %233 : vector<2x8x8xf32>
    %cst_98 = arith.constant dense<0.000000e+00> : vector<2x8xf32>
    %235 = vector.multi_reduction <add>, %234, %cst_98 [2] : vector<2x8x8xf32> to vector<2x8xf32>
    %236 = vector.shape_cast %235 : vector<2x8xf32> to vector<2x8x1xf32>
    %237 = tpu.reciprocal %236 {approx = true} : vector<2x8x1xf32> -> vector<2x8x1xf32>
    %238 = vector.broadcast %237 : vector<2x8x1xf32> to vector<2x8x8xf32>
    %239 = arith.mulf %234, %238 : vector<2x8x8xf32>
    "tpu.trace_start"() <{level = 10 : i32, message = "bqk,bkd->bqd"}> : () -> ()
    %cst_99 = arith.constant dense<0.000000e+00> : vector<2x8x8xf32>
    %240 = tpu.matmul %239, %226, %cst_99 {dimension_numbers = #tpu.dot_dimension_numbers<[2], [1], [1], [2], [0, 0, 0, 1, 1, 2], [0], [0]>} : vector<2x8x8xf32>, vector<2x8x8xf32>, vector<2x8x8xf32> -> vector<2x8x8xf32>
    "tpu.trace_stop"() : () -> ()
    %241 = vector.extract_strided_slice %185 {offsets = [0, 0, 24], sizes = [2, 8, 8], strides = [1, 1, 1]} : vector<2x8x32xf32> to vector<2x8x8xf32>
    %242 = vector.extract_strided_slice %187 {offsets = [0, 0, 24], sizes = [2, 8, 8], strides = [1, 1, 1]} : vector<2x8x32xf32> to vector<2x8x8xf32>
    %243 = vector.extract_strided_slice %189 {offsets = [0, 0, 24], sizes = [2, 8, 8], strides = [1, 1, 1]} : vector<2x8x32xf32> to vector<2x8x8xf32>
    "tpu.trace_start"() <{level = 10 : i32, message = "bqd,bkd->bqk"}> : () -> ()
    %cst_100 = arith.constant dense<0.000000e+00> : vector<2x8x8xf32>
    %244 = tpu.matmul %241, %242, %cst_100 {dimension_numbers = #tpu.dot_dimension_numbers<[2], [2], [1], [1], [0, 0, 0, 1, 1, 1], [0], [0]>} : vector<2x8x8xf32>, vector<2x8x8xf32>, vector<2x8x8xf32> -> vector<2x8x8xf32>
    "tpu.trace_stop"() : () -> ()
    %cst_101 = arith.constant 0.353553385 : f32
    %245 = vector.broadcast %cst_101 : f32 to vector<2x8x8xf32>
    %246 = arith.mulf %244, %245 : vector<2x8x8xf32>
    %cst_102 = arith.constant dense<0xFF800000> : vector<2x8xf32>
    %247 = vector.multi_reduction <maximumf>, %246, %cst_102 [2] : vector<2x8x8xf32> to vector<2x8xf32>
    %248 = vector.shape_cast %247 : vector<2x8xf32> to vector<2x8x1xf32>
    %249 = vector.broadcast %248 : vector<2x8x1xf32> to vector<2x8x8xf32>
    %250 = arith.subf %246, %249 : vector<2x8x8xf32>
    %251 = math.exp %250 : vector<2x8x8xf32>
    %cst_103 = arith.constant dense<0.000000e+00> : vector<2x8xf32>
    %252 = vector.multi_reduction <add>, %251, %cst_103 [2] : vector<2x8x8xf32> to vector<2x8xf32>
    %253 = vector.shape_cast %252 : vector<2x8xf32> to vector<2x8x1xf32>
    %254 = tpu.reciprocal %253 {approx = true} : vector<2x8x1xf32> -> vector<2x8x1xf32>
    %255 = vector.broadcast %254 : vector<2x8x1xf32> to vector<2x8x8xf32>
    %256 = arith.mulf %251, %255 : vector<2x8x8xf32>
    "tpu.trace_start"() <{level = 10 : i32, message = "bqk,bkd->bqd"}> : () -> ()
    %cst_104 = arith.constant dense<0.000000e+00> : vector<2x8x8xf32>
    %257 = tpu.matmul %256, %243, %cst_104 {dimension_numbers = #tpu.dot_dimension_numbers<[2], [1], [1], [2], [0, 0, 0, 1, 1, 2], [0], [0]>} : vector<2x8x8xf32>, vector<2x8x8xf32>, vector<2x8x8xf32> -> vector<2x8x8xf32>
    "tpu.trace_stop"() : () -> ()
    %258 = tpu.concatenate %206, %223, %240, %257 in 2 : vector<2x8x8xf32>, vector<2x8x8xf32>, vector<2x8x8xf32>, vector<2x8x8xf32> -> vector<2x8x32xf32>
    %259 = vector.shape_cast %258 : vector<2x8x32xf32> to vector<16x32xf32>
    %c1_105 = arith.constant 1 : index
    %c0_106 = arith.constant 0 : index
    %c0_107 = arith.constant 0 : index
    %260 = vector.load %arg6[%c1_105, %c0_106, %c0_107] : memref<2x32x32xf32, #tpu.memory_space<vmem>>, vector<1x32x32xf32>
    %261 = vector.shape_cast %260 : vector<1x32x32xf32> to vector<32x32xf32>
    %cst_108 = arith.constant dense<0.000000e+00> : vector<16x32xf32>
    %262 = tpu.matmul %259, %261, %cst_108 {dimension_numbers = #tpu.dot_dimension_numbers<[1], [0], [0], [1], [0, 0, 1, 1], [], []>} : vector<16x32xf32>, vector<32x32xf32>, vector<16x32xf32> -> vector<16x32xf32>
    %c1_109 = arith.constant 1 : index
    %c0_110 = arith.constant 0 : index
    %c0_111 = arith.constant 0 : index
    %263 = vector.load %arg7[%c1_109, %c0_110, %c0_111] : memref<2x1x32xf32, #tpu.memory_space<vmem>>, vector<1x1x32xf32>
    %264 = vector.shape_cast %263 : vector<1x1x32xf32> to vector<1x32xf32>
    %265 = vector.broadcast %264 : vector<1x32xf32> to vector<16x32xf32>
    %266 = arith.addf %262, %265 : vector<16x32xf32>
    %267 = arith.addf %176, %266 : vector<16x32xf32>
    %cst_112 = arith.constant dense<0.000000e+00> : vector<16xf32>
    %268 = vector.multi_reduction <add>, %267, %cst_112 [1] : vector<16x32xf32> to vector<16xf32>
    %269 = vector.shape_cast %268 : vector<16xf32> to vector<16x1xf32>
    %cst_113 = arith.constant 3.200000e+01 : f32
    %270 = vector.broadcast %cst_113 : f32 to vector<16x1xf32>
    %271 = arith.divf %269, %270 : vector<16x1xf32>
    %272 = vector.broadcast %271 : vector<16x1xf32> to vector<16x32xf32>
    %273 = arith.subf %267, %272 : vector<16x32xf32>
    %274 = arith.mulf %273, %273 : vector<16x32xf32>
    %cst_114 = arith.constant dense<0.000000e+00> : vector<16xf32>
    %275 = vector.multi_reduction <add>, %274, %cst_114 [1] : vector<16x32xf32> to vector<16xf32>
    %276 = vector.shape_cast %275 : vector<16xf32> to vector<16x1xf32>
    %cst_115 = arith.constant 3.200000e+01 : f32
    %277 = vector.broadcast %cst_115 : f32 to vector<16x1xf32>
    %278 = arith.divf %276, %277 : vector<16x1xf32>
    %279 = vector.broadcast %271 : vector<16x1xf32> to vector<16x32xf32>
    %280 = arith.subf %267, %279 : vector<16x32xf32>
    %cst_116 = arith.constant 9.99999974E-6 : f32
    %281 = vector.broadcast %cst_116 : f32 to vector<16x1xf32>
    %282 = arith.addf %278, %281 : vector<16x1xf32>
    %283 = math.rsqrt %282 : vector<16x1xf32>
    %284 = vector.broadcast %283 : vector<16x1xf32> to vector<16x32xf32>
    %285 = arith.mulf %280, %284 : vector<16x32xf32>
    %c1_117 = arith.constant 1 : index
    %c0_118 = arith.constant 0 : index
    %c0_119 = arith.constant 0 : index
    %286 = vector.load %arg8[%c1_117, %c0_118, %c0_119] : memref<2x1x32xf32, #tpu.memory_space<vmem>>, vector<1x1x32xf32>
    %287 = vector.shape_cast %286 : vector<1x1x32xf32> to vector<1x32xf32>
    %288 = vector.broadcast %287 : vector<1x32xf32> to vector<16x32xf32>
    %289 = arith.mulf %285, %288 : vector<16x32xf32>
    %c1_120 = arith.constant 1 : index
    %c0_121 = arith.constant 0 : index
    %c0_122 = arith.constant 0 : index
    %290 = vector.load %arg9[%c1_120, %c0_121, %c0_122] : memref<2x1x32xf32, #tpu.memory_space<vmem>>, vector<1x1x32xf32>
    %291 = vector.shape_cast %290 : vector<1x1x32xf32> to vector<1x32xf32>
    %292 = vector.broadcast %291 : vector<1x32xf32> to vector<16x32xf32>
    %293 = arith.addf %289, %292 : vector<16x32xf32>
    %c1_123 = arith.constant 1 : index
    %c0_124 = arith.constant 0 : index
    %c0_125 = arith.constant 0 : index
    %294 = vector.load %arg10[%c1_123, %c0_124, %c0_125] : memref<2x32x32xf32, #tpu.memory_space<vmem>>, vector<1x32x32xf32>
    %295 = vector.shape_cast %294 : vector<1x32x32xf32> to vector<32x32xf32>
    %cst_126 = arith.constant dense<0.000000e+00> : vector<16x32xf32>
    %296 = tpu.matmul %293, %295, %cst_126 {dimension_numbers = #tpu.dot_dimension_numbers<[1], [0], [0], [1], [0, 0, 1, 1], [], []>} : vector<16x32xf32>, vector<32x32xf32>, vector<16x32xf32> -> vector<16x32xf32>
    %c1_127 = arith.constant 1 : index
    %c0_128 = arith.constant 0 : index
    %c0_129 = arith.constant 0 : index
    %297 = vector.load %arg11[%c1_127, %c0_128, %c0_129] : memref<2x1x32xf32, #tpu.memory_space<vmem>>, vector<1x1x32xf32>
    %298 = vector.shape_cast %297 : vector<1x1x32xf32> to vector<1x32xf32>
    %299 = vector.broadcast %298 : vector<1x32xf32> to vector<16x32xf32>
    %300 = arith.addf %296, %299 : vector<16x32xf32>
    %cst_130 = arith.constant 0.000000e+00 : f32
    %301 = vector.broadcast %cst_130 : f32 to vector<16x32xf32>
    %302 = arith.maximumf %300, %301 : vector<16x32xf32>
    %c1_131 = arith.constant 1 : index
    %c0_132 = arith.constant 0 : index
    %c0_133 = arith.constant 0 : index
    %303 = vector.load %arg12[%c1_131, %c0_132, %c0_133] : memref<2x32x32xf32, #tpu.memory_space<vmem>>, vector<1x32x32xf32>
    %304 = vector.shape_cast %303 : vector<1x32x32xf32> to vector<32x32xf32>
    %cst_134 = arith.constant dense<0.000000e+00> : vector<16x32xf32>
    %305 = tpu.matmul %302, %304, %cst_134 {dimension_numbers = #tpu.dot_dimension_numbers<[1], [0], [0], [1], [0, 0, 1, 1], [], []>} : vector<16x32xf32>, vector<32x32xf32>, vector<16x32xf32> -> vector<16x32xf32>
    %c1_135 = arith.constant 1 : index
    %c0_136 = arith.constant 0 : index
    %c0_137 = arith.constant 0 : index
    %306 = vector.load %arg13[%c1_135, %c0_136, %c0_137] : memref<2x1x32xf32, #tpu.memory_space<vmem>>, vector<1x1x32xf32>
    %307 = vector.shape_cast %306 : vector<1x1x32xf32> to vector<1x32xf32>
    %308 = vector.broadcast %307 : vector<1x32xf32> to vector<16x32xf32>
    %309 = arith.addf %305, %308 : vector<16x32xf32>
    %310 = arith.addf %293, %309 : vector<16x32xf32>
    %cst_138 = arith.constant dense<0.000000e+00> : vector<16xf32>
    %311 = vector.multi_reduction <add>, %310, %cst_138 [1] : vector<16x32xf32> to vector<16xf32>
    %312 = vector.shape_cast %311 : vector<16xf32> to vector<16x1xf32>
    %cst_139 = arith.constant 3.200000e+01 : f32
    %313 = vector.broadcast %cst_139 : f32 to vector<16x1xf32>
    %314 = arith.divf %312, %313 : vector<16x1xf32>
    %315 = vector.broadcast %314 : vector<16x1xf32> to vector<16x32xf32>
    %316 = arith.subf %310, %315 : vector<16x32xf32>
    %317 = arith.mulf %316, %316 : vector<16x32xf32>
    %cst_140 = arith.constant dense<0.000000e+00> : vector<16xf32>
    %318 = vector.multi_reduction <add>, %317, %cst_140 [1] : vector<16x32xf32> to vector<16xf32>
    %319 = vector.shape_cast %318 : vector<16xf32> to vector<16x1xf32>
    %cst_141 = arith.constant 3.200000e+01 : f32
    %320 = vector.broadcast %cst_141 : f32 to vector<16x1xf32>
    %321 = arith.divf %319, %320 : vector<16x1xf32>
    %322 = vector.broadcast %314 : vector<16x1xf32> to vector<16x32xf32>
    %323 = arith.subf %310, %322 : vector<16x32xf32>
    %cst_142 = arith.constant 9.99999974E-6 : f32
    %324 = vector.broadcast %cst_142 : f32 to vector<16x1xf32>
    %325 = arith.addf %321, %324 : vector<16x1xf32>
    %326 = math.rsqrt %325 : vector<16x1xf32>
    %327 = vector.broadcast %326 : vector<16x1xf32> to vector<16x32xf32>
    %328 = arith.mulf %323, %327 : vector<16x32xf32>
    %c1_143 = arith.constant 1 : index
    %c0_144 = arith.constant 0 : index
    %c0_145 = arith.constant 0 : index
    %329 = vector.load %arg14[%c1_143, %c0_144, %c0_145] : memref<2x1x32xf32, #tpu.memory_space<vmem>>, vector<1x1x32xf32>
    %330 = vector.shape_cast %329 : vector<1x1x32xf32> to vector<1x32xf32>
    %331 = vector.broadcast %330 : vector<1x32xf32> to vector<16x32xf32>
    %332 = arith.mulf %328, %331 : vector<16x32xf32>
    %c1_146 = arith.constant 1 : index
    %c0_147 = arith.constant 0 : index
    %c0_148 = arith.constant 0 : index
    %333 = vector.load %arg15[%c1_146, %c0_147, %c0_148] : memref<2x1x32xf32, #tpu.memory_space<vmem>>, vector<1x1x32xf32>
    %334 = vector.shape_cast %333 : vector<1x1x32xf32> to vector<1x32xf32>
    %335 = vector.broadcast %334 : vector<1x32xf32> to vector<16x32xf32>
    %336 = arith.addf %332, %335 : vector<16x32xf32>
    %337 = vector.shape_cast %336 : vector<16x32xf32> to vector<2x8x32xf32>
    %cst_149 = arith.constant dense<0.000000e+00> : vector<8x32xf32>
    %338 = vector.multi_reduction <add>, %337, %cst_149 [0] : vector<2x8x32xf32> to vector<8x32xf32>
    %cst_150 = arith.constant 2.000000e+00 : f32
    %339 = vector.broadcast %cst_150 : f32 to vector<8x32xf32>
    %340 = arith.divf %338, %339 : vector<8x32xf32>
    %c0_151 = arith.constant 0 : index
    %c0_152 = arith.constant 0 : index
    %341 = vector.load %arg16[%c0_151, %c0_152] : memref<32x8xf32, #tpu.memory_space<vmem>>, vector<32x8xf32>
    %cst_153 = arith.constant dense<0.000000e+00> : vector<8x8xf32>
    %342 = tpu.matmul %340, %341, %cst_153 {dimension_numbers = #tpu.dot_dimension_numbers<[1], [0], [0], [1], [0, 0, 1, 1], [], []>} : vector<8x32xf32>, vector<32x8xf32>, vector<8x8xf32> -> vector<8x8xf32>
    %c0_154 = arith.constant 0 : index
    %c0_155 = arith.constant 0 : index
    %343 = vector.load %arg17[%c0_154, %c0_155] : memref<1x8xf32, #tpu.memory_space<vmem>>, vector<1x8xf32>
    %344 = vector.broadcast %343 : vector<1x8xf32> to vector<8x8xf32>
    %345 = arith.addf %342, %344 : vector<8x8xf32>
    %c0_156 = arith.constant 0 : index
    %c0_157 = arith.constant 0 : index
    %346 = vector.load %arg18[%c0_156, %c0_157] : memref<8x8xf32, #tpu.memory_space<vmem>>, vector<8x8xf32>
    tpu.vector_store %arg18[%c0_156, %c0_157], %345 {strides = array<i32>} : memref<8x8xf32, #tpu.memory_space<vmem>>, vector<8x8xf32>,
    return
  }
}

</mosaic_0001>

<bundles_post_ra>
// kernel: transformer_forward.1
= control target key start
LH: loop header
LB: loop body
LE: loop exit
PB: predicated region body
PF: predicated region fallthrough
CT: control target
= control target key end

     0   :  { %s2742_s0 = inlined_call_operand.vmem [shape: f32[8,2,16], index: 0, kind: input, shape index: {}]   ;;  %s2743_s1 = inlined_call_operand.vmem [shape: f32[256,32], index: 1, kind: input, shape index: {}]   ;;  %s2744_s2 = inlined_call_operand.vmem [shape: f32[16,32], index: 2, kind: input, shape index: {}]   ;;  %s2745_s3 = inlined_call_operand.vmem [shape: f32[1,32], index: 3, kind: input, shape index: {}]   ;;  %s2746_s4 = inlined_call_operand.vmem [shape: f32[2,32,128], index: 4, kind: input, shape index: {}]   ;;  %s2747_s5 = inlined_call_operand.vmem [shape: f32[2,1,128], index: 5, kind: input, shape index: {}]   ;;  %s2748_s6 = inlined_call_operand.vmem [shape: f32[2,32,32], index: 6, kind: input, shape index: {}]   ;;  %s2749_s7 = inlined_call_operand.vmem [shape: f32[2,1,32], index: 7, kind: input, shape index: {}]   ;;  %s2750_s8 = inlined_call_operand.vmem [shape: f32[2,1,32], index: 8, kind: input, shape index: {}]   ;;  %s2751_s9 = inlined_call_operand.vmem [shape: f32[2,1,32], index: 9, kind: input, shape index: {}]   ;;  %s2752_s10 = inlined_call_operand.vmem [shape: f32[2,32,32], index: 10, kind: input, shape index: {}]   ;;  %s2753_s11 = inlined_call_operand.vmem [shape: f32[2,1,32], index: 11, kind: input, shape index: {}]   ;;  %s2754_s12 = inlined_call_operand.vmem [shape: f32[2,32,32], index: 12, kind: input, shape index: {}]   ;;  %s2755_s13 = inlined_call_operand.vmem [shape: f32[2,1,32], index: 13, kind: input, shape index: {}]   ;;  %s2756_s14 = inlined_call_operand.vmem [shape: f32[2,1,32], index: 14, kind: input, shape index: {}]   ;;  %s2757_s15 = inlined_call_operand.vmem [shape: f32[2,1,32], index: 15, kind: input, shape index: {}]   ;;  %s2758_s16 = inlined_call_operand.vmem [shape: f32[32,8], index: 16, kind: input, shape index: {}]   ;;  %s2759_s17 = inlined_call_operand.vmem [shape: f32[1,8], index: 17, kind: input, shape index: {}]   ;;  %s2760_s18 = inlined_call_operand.hbm [shape: f32[8,8], index: 18, kind: output, shape index: {}]  }
   0x1   :  { %2773 = sst [smem:[#allocation5_spill]] %s2742_s0 }
   0x2   :  { %2774 = sst [smem:[#allocation6_spill]] %s2743_s1 }
   0x3   :  { %2775 = sst [smem:[#allocation7_spill]] %s2744_s2 }
   0x4   :  { %s2776_s29 = sld [smem:[#allocation7_spill]]  ;;  %vm77_vm0 = vcmask 1041409   ;;  %vm80_vm1 = vcmask 1042434   ;;  %vm83_vm2 = vcmask 1043459   ;;  %vm86_vm3 = vcmask 1044484   ;;  %v151_v15 = vld [vmem:[%s2746_s4 + $0x18] sm:$0xff] }
   0x5   :  { %s2777_s20 = sld [smem:[#allocation5_spill]]  ;;  %vm89_vm4 = vcmask 1045509   ;;  %vm92_vm5 = vcmask 1046534   ;;  %175 = vmatpush.msra.mxu1 %v151_v15  ;;  %vm95_vm6 = vcmask 1047559   ;;  %vm117_vm7 = vcmask 130048  }
   0xa   :  { %v112_v0 = vld [vmem:[%s2776_s29 + $0x8] sm:$0xff]  ;;  %v111_v1 = vld [vmem:[%s2776_s29] sm:$0xff] }
   0xb   :  { %v60_v2 = vld [vmem:[%s2777_s20] sm:$0x3]  ;;  %136 = vmatpush.msra.mxu0 %v112_v0  ;;  %v61_v3 = vld [vmem:[%s2777_s20 + $0x2] sm:$0x3]  ;;  %v62_v4 = vld [vmem:[%s2777_s20 + $0x4] sm:$0x3] }
   0xc   :  { %v63_v5 = vld [vmem:[%s2777_s20 + $0x6] sm:$0x3]  ;;  %v64_v6 = vld [vmem:[%s2777_s20 + $0x8] sm:$0x3]  ;;  %v65_v7 = vld [vmem:[%s2777_s20 + $0xa] sm:$0x3] }
   0xd   :  { %v66_v8 = vld [vmem:[%s2777_s20 + $0xc] sm:$0x3]  ;;  %137 = vmatpush.msra.mxu0 %v111_v1  ;;  %v67_v9 = vld [vmem:[%s2777_s20 + $0xe] sm:$0x3]  ;;  %v76_v10 = vrot.slane %v61_v3, 7  ;;  %v79_v11 = vrot.slane %v62_v4, 6 }
   0xe   :  { %v82_v12 = vrot.slane %v63_v5, 5  ;;  %v85_v13 = vrot.slane %v64_v6, 4  ;;  %v88_v14 = vrot.slane %v65_v7, 3  ;;  %v91_v17 = vrot.slane %v66_v8, 2 }
   0xf   :  { %v78_v16 = vsel %vm77_vm0, %v76_v10, %v60_v2  ;;  %v94_v19 = vrot.slane %v67_v9, 1  ;;  %v97_v20 = vrot.slane %v60_v2, 1  ;;  %v99_v22 = vrot.slane %v62_v4, 7 }
  0x10   :  { %v81_v18 = vsel %vm80_vm1, %v79_v11, %v78_v16  ;;  %v101_v23 = vrot.slane %v63_v5, 6  ;;  %v103_v24 = vrot.slane %v64_v6, 5  ;;  %v105_v27 = vrot.slane %v65_v7, 4 }
  0x11   :  { %v84_v21 = vsel %vm83_vm2, %v82_v12, %v81_v18  ;;  %v98_v26 = vsel %vm77_vm0, %v61_v3, %v97_v20  ;;  %v107_v30 = vrot.slane %v66_v8, 3  ;;  %v109_v31 = vrot.slane %v67_v9, 2 }
  0x12   :  { %v87_v25 = vsel %vm86_vm3, %v85_v13, %v84_v21  ;;  %v100_v29 = vsel %vm80_vm1, %v99_v22, %v98_v26 }
  0x13   :  { %v90_v28 = vsel %vm89_vm4, %v88_v14, %v87_v25  ;;  %v102_v33 = vsel %vm83_vm2, %v101_v23, %v100_v29 }
  0x14   :  { %v93_v32 = vsel %vm92_vm5, %v91_v17, %v90_v28  ;;  %v104_v35 = vsel %vm86_vm3, %v103_v24, %v102_v33 }
  0x15   :  { %v96_v34 = vsel %vm95_vm6, %v94_v19, %v93_v32  ;;  %v106_v36 = vsel %vm89_vm4, %v105_v27, %v104_v35 }
  0x16   :  { %1873 = vmatmul.msk.f32.vlgmr.msra.gmra.mxu0 %vm117_vm7, %v96_v34  ;;  %v108_v37 = vsel %vm92_vm5, %v107_v30, %v106_v36 }
  0x17   :  { %23 = vsyncpa [#allocation3], 0  ;;  %v110_v38 = vsel %vm95_vm6, %v109_v31, %v108_v37  ;;  %v150_v39 = vld [vmem:[%s2746_s4 + $0x10] sm:$0xff]  ;;  %v149_v40 = vld [vmem:[%s2746_s4 + $0x8] sm:$0xff]  ;;  %s2778_s0 = sld [smem:[#allocation6_spill]]  ;;  %vm156_vm8 = vcmask 261120  }
  0x18   :  { %176 = vmatpush.msra.mxu1 %v150_v39  ;;  %v148_v41 = vld [vmem:[%s2746_s4] sm:$0xff]  ;;  %s2124_s1 = smov 88   ;;  %s2125_s21 = smov 96   ;;  %vm189_vm9 = vcmask 64512   ;;  %vm741_vm10 = vcmask 195584  }
  0x19   :  { %v1996_v42 = vld [vmem:[%s2745_s3] ss:$0 sm:$0xff]  ;;  %s2768_s22 = smov 64   ;;  %s2127_s20 = smov 120  }
  0x1a   :  { %177 = vmatpush.msra.mxu1 %v149_v40  ;;  %v1997_v50 = vld [vmem:[%s2747_s5] ss:$0 sm:$0xff]  ;;  %s2128_s2 = smov 80   ;;  %s2129_s23 = smov 112  }
  0x1b   :  { %s2130_s24 = smov 104   ;;  %s2131_s25 = smov 72  }
  0x1c   :  { %178 = vmatpush.msra.mxu1 %v148_v41  ;;  %s2767_s26 = smov 56   ;;  %s2763_s27 = smov 40  }
  0x1d   :  { %v145_v44 = vld [vmem:[%s2778_s0] sm:$0xff]  ;;  %s2765_s28 = smov 48   ;;  %s2769_s29 = smov 8  }
  0x1e   :  { %1874 = vmatmul.msk.f32.gmra.mxu0 %vm117_vm7, %v110_v38  ;;  %s2771_s30 = smov 16   ;;  %s2137_s0 = smov 24  }
  0x1f   :  { %s1864_s19 = sshll.u32 %s2760_s18, 4  ;;  %s1865_s19 = int_to_ptr.hbm [resolvable:$true] %s1864_s19 }
  0x93   :  { %v139_v43 = vpop.f32.mrf.mxu0 }
  0x94   :  { %v140_v45 = vadd.f32 %v1996_v42, %v139_v43 }
  0x96   :  { %v2300_v46 = vadd.f32 %v145_v44, %v140_v45 }
  0x98   :  { %1875 = vmatmul.msk.f32.vlgmr.msra.gmra.mxu1 %vm156_vm8, %v2300_v46 }
  0x9b   :  { %v142_v47 = vpop.f32.mrf.mxu0 }
  0x9c   :  { %v143_v48 = vadd.f32 %v1996_v42, %v142_v47 }
  0x9e   :  { %v2304_v49 = vadd.f32 %v145_v44, %v143_v48 }
  0xa0   :  { %1876 = vmatmul.msk.f32.gmra.mxu1 %vm156_vm8, %v2304_v49 }
 0x115   :  { %v180_v51 = vpop.f32.mrf.mxu1 }
 0x116   :  { %v2311_v52 = vadd.f32 %v1997_v50, %v180_v51 }
 0x118   :  { %319 = vrot.lane.b32.xlu2 %v2311_v52, %s2124_s1  ;;  %187 = vrot.lane.b32.xlu0 %v2311_v52, %s2125_s21 }
 0x11d   :  { %v183_v53 = vpop.f32.mrf.mxu1 }
 0x11e   :  { %v2317_v54 = vadd.f32 %v1997_v50, %v183_v53 }
 0x120   :  { %265 = vrot.lane.b32.xlu2 %v2311_v52, %s2768_s22  ;;  %215 = vrot.lane.b32.xlu1 %v2317_v54, %s2125_s21 }
 0x128   :  { %317 = vrot.lane.b32.xlu2 %v2311_v52, %s2127_s20 }
 0x130   :  { %347 = vrot.lane.b32.xlu2 %v2317_v54, %s2124_s1 }
 0x138   :  { %451 = vrot.lane.b32.xlu2 %v2311_v52, %s2128_s2 }
 0x140   :  { %345 = vrot.lane.b32.xlu2 %v2317_v54, %s2127_s20 }
 0x148   :  { %449 = vrot.lane.b32.xlu2 %v2311_v52, %s2129_s23 }
 0x150   :  { %477 = vrot.lane.b32.xlu2 %v2317_v54, %s2129_s23 }
 0x158   :  { %581 = vrot.lane.b32.xlu2 %v2311_v52, %s2130_s24 }
 0x160   :  { %609 = vrot.lane.b32.xlu2 %v2317_v54, %s2130_s24 }
 0x172   :  { %v320_v55 = vpop.permute.xlu2 %319 }
 0x173   :  { %1883 = vmatpush.xpose.msk.msrb.mxu0 %vm189_vm9, %v320_v55 }
 0x17a   :  { %v266_v56 = vpop.permute.xlu2 %265 }
 0x182   :  { %v318_v57 = vpop.permute.xlu2 %317 }
 0x183   :  { %1884 = vmatmul.msk.f32.vlgmr.msrb.gmra.mxu0 %vm189_vm9, %v318_v57 }
 0x18a   :  { %v348_v58 = vpop.permute.xlu2 %347  ;;  %v188_v59 = vpop.permute.xlu0 %187 }
 0x18b   :  { %1877 = vmatpush.xpose.msk.msra.mxu2 %vm189_vm9, %v188_v59  ;;  %v1981_v59 = vpack.i.bf16 %v2317_v54, %v2311_v52 }
 0x18e   :  { %1878 = vmatmul.msk.f32.vlgmr.msra.gmra.mxu2 %vm189_vm9, %v2311_v52 }
 0x18f   :  { %286 = vmatpush.msrb.mxu2 %v266_v56 }
 0x191   :  { %1885 = vmatpush.xpose.msk.msra.mxu2 %vm189_vm9, %v348_v58 }
 0x192   :  { %v452_v60 = vpop.permute.xlu2 %451  ;;  %v216_v0 = vpop.permute.xlu1 %215 }
 0x193   :  { %1889 = vmatpush.xpose.msk.msra.mxu0 %vm189_vm9, %v452_v60  ;;  %1879 = vmatpush.xpose.msk.msra.mxu3 %vm189_vm9, %v216_v0 }
 0x196   :  { %1880 = vmatmul.msk.f32.vlgmr.msra.gmra.mxu3 %vm189_vm9, %v2317_v54 }
 0x19a   :  { %v346_v61 = vpop.permute.xlu2 %345 }
 0x1a2   :  { %v450_v62 = vpop.permute.xlu2 %449 }
 0x1a3   :  { %1890 = vmatmul.msk.f32.vlgmr.msra.gmra.mxu0 %vm189_vm9, %v450_v62 }
 0x1aa   :  { %v478_v27 = vpop.permute.xlu2 %477 }
 0x1b2   :  { %v582_v29 = vpop.permute.xlu2 %581 }
 0x1ba   :  { %v610_v30 = vpop.permute.xlu2 %609 }
 0x200   :  { %v342_v3 = vpop.f32.mrf.mxu0 }
 0x201   :  { %v373_v7 = vmul.f32 0.35355338, %v342_v3 }
 0x203   :  { %v375_v8 = vsel %vm189_vm9, %v373_v7, -inf }
 0x211   :  { %v211_v63 = vpop.f32.mrf.mxu2 }
 0x212   :  { %v241_v1 = vmul.f32 0.35355338, %v211_v63 }
 0x214   :  { %v243_v2 = vsel %vm189_vm9, %v241_v1, -inf }
 0x215   :  { %244 = vmax.xlane.f32.xlu0 %v243_v2 }
 0x219   :  { %v238_v17 = vpop.f32.mrf.mxu3 }
 0x21a   :  { %v242_v20 = vmul.f32 0.35355338, %v238_v17 }
 0x21c   :  { %v246_v21 = vsel %vm189_vm9, %v242_v20, -inf }
 0x220   :  { %v474_v4 = vpop.f32.mrf.mxu0 }
 0x221   :  { %v505_v5 = vmul.f32 0.35355338, %v474_v4 }
 0x223   :  { %v507_v6 = vsel %vm189_vm9, %v505_v5, -inf }
 0x224   :  { %508 = vmax.xlane.f32.xlu2 %v507_v6 }
 0x229   :  { %479 = vrot.lane.b32.xlu0 %v2317_v54, %s2128_s2 }
 0x231   :  { %611 = vrot.lane.b32.xlu0 %v2317_v54, %s2131_s25 }
 0x25b   :  { %376 = vmax.xlane.f32.xlu0 %v375_v8 }
 0x288   :  { %v245_v9 = vpop.xlane.xlu0 %244 }
 0x289   :  { %v249_v10 = vsub.f32 %v241_v1, %v245_v9 }
 0x28b   :  { %v251_v11 = vmul.f32 1.442695, %v249_v10 }
 0x28d   :  { %2014 = vpow2.f32 %v251_v11 }
 0x293   :  { %v2015_v12 = vpop.eup %2014 }
 0x294   :  { %v255_v13 = vsel %vm189_vm9, %v2015_v12, 0.0 }
 0x295   :  { %256 = vadd.xlane.f32.xlu1 %v255_v13 }
 0x297   :  { %v509_v34 = vpop.xlane.xlu2 %508 }
 0x298   :  { %v513_v35 = vsub.f32 %v505_v5, %v509_v34 }
 0x29a   :  { %v515_v38 = vmul.f32 1.442695, %v513_v35 }
 0x29b   :  { %v480_v14 = vpop.permute.xlu0 %479 }
 0x2a3   :  { %v612_v15 = vpop.permute.xlu0 %611 }
 0x2ae   :  { %583 = vrot.lane.b32.xlu1 %v2311_v52, %s2131_s25 }
 0x2ce   :  { %v377_v16 = vpop.xlane.xlu0 %376 }
 0x2cf   :  { %v381_v18 = vsub.f32 %v373_v7, %v377_v16 }
 0x2d1   :  { %v383_v19 = vmul.f32 1.442695, %v381_v18 }
 0x2d3   :  { %2016 = vpow2.f32 %v383_v19 }
 0x2d8   :  { %247 = vmax.xlane.f32.xlu1 %v246_v21 }
 0x2d9   :  { %v2361_v22 = vpop.eup %2016 }
 0x2da   :  { %v387_v23 = vsel %vm189_vm9, %v2361_v22, 0.0 }
 0x2db   :  { %388 = vadd.xlane.f32.xlu2 %v387_v23 }
 0x2f1   :  { %291 = vrot.lane.b32.xlu1 %v2317_v54, %s2768_s22 }
 0x308   :  { %v257_v24 = vpop.xlane.xlu1 %256 }
 0x309   :  { %2018 = vrcp.f32 %v257_v24 }
 0x30a   :  { %2020 = vpow2.f32 %v515_v38 }
 0x30f   :  { %v2019_v25 = vpop.eup %2018 }
 0x310   :  { %v263_v26 = vmul.f32 %v2019_v25, %v2015_v12  ;;  %v2380_v50 = vpop.eup %2020 }
 0x311   :  { %v519_v51 = vsel %vm189_vm9, %v2380_v50, 0.0 }
 0x312   :  { %1881 = vmatmul.msk.f32.vlgmr.msrb.gmra.mxu2 %vm189_vm9, %v263_v26 }
 0x313   :  { %1891 = vmatpush.xpose.msk.msrb.mxu2 %vm189_vm9, %v480_v14 }
 0x31a   :  { %1886 = vmatmul.msk.f32.vlgmr.msra.gmra.mxu2 %vm189_vm9, %v346_v61 }
 0x31b   :  { %1897 = vmatpush.xpose.msk.msra.mxu2 %vm189_vm9, %v612_v15 }
 0x320   :  { %v584_v28 = vpop.permute.xlu1 %583 }
 0x321   :  { %1895 = vmatpush.xpose.msk.msrb.mxu0 %vm189_vm9, %v584_v28 }
 0x322   :  { %1892 = vmatmul.msk.f32.vlgmr.msrb.gmra.mxu2 %vm189_vm9, %v478_v27 }
 0x324   :  { %1896 = vmatmul.msk.f32.vlgmr.msrb.gmra.mxu0 %vm189_vm9, %v582_v29 }
 0x32a   :  { %1898 = vmatmul.msk.f32.vlgmr.msra.gmra.mxu2 %vm189_vm9, %v610_v30 }
 0x34b   :  { %v248_v31 = vpop.xlane.xlu1 %247 }
 0x34c   :  { %v250_v42 = vsub.f32 %v242_v20, %v248_v31 }
 0x34e   :  { %v253_v47 = vmul.f32 1.442695, %v250_v42  ;;  %v389_v60 = vpop.xlane.xlu2 %388 }
 0x350   :  { %2022 = vpow2.f32 %v253_v47 }
 0x356   :  { %v2023_v57 = vpop.eup %2022 }
 0x357   :  { %v258_v58 = vsel %vm189_vm9, %v2023_v57, 0.0 }
 0x363   :  { %v292_v32 = vpop.permute.xlu1 %291 }
 0x364   :  { %312 = vmatpush.msrb.mxu3 %v292_v32 }
 0x395   :  { %v2375_v33 = vpop.f32.mrf.mxu2 }
 0x39d   :  { %v370_v36 = vpop.f32.mrf.mxu2 }
 0x39e   :  { %v374_v37 = vmul.f32 0.35355338, %v370_v36 }
 0x3a0   :  { %v378_v39 = vsel %vm189_vm9, %v374_v37, -inf }
 0x3a1   :  { %379 = vmax.xlane.f32.xlu1 %v378_v39  ;;  %v606_v40 = vpop.f32.mrf.mxu0 }
 0x3a2   :  { %v637_v41 = vmul.f32 0.35355338, %v606_v40 }
 0x3a4   :  { %v639_v43 = vsel %vm189_vm9, %v637_v41, -inf }
 0x3a5   :  { %640 = vmax.xlane.f32.xlu0 %v639_v43  ;;  %v502_v44 = vpop.f32.mrf.mxu2 }
 0x3a6   :  { %v506_v45 = vmul.f32 0.35355338, %v502_v44 }
 0x3a8   :  { %v510_v48 = vsel %vm189_vm9, %v506_v45, -inf }
 0x3a9   :  { %511 = vmax.xlane.f32.xlu2 %v510_v48 }
 0x3ad   :  { %520 = vadd.xlane.f32.xlu0 %v519_v51  ;;  %v634_v53 = vpop.f32.mrf.mxu2 }
 0x3ae   :  { %v638_v55 = vmul.f32 0.35355338, %v634_v53  ;;  %v747_v53 = vld [vmem:[%s2748_s6 + $0x18] sm:$0xff] }
 0x3af   :  { %770 = vmatpush.msra.mxu0 %v747_v53 }
 0x3b0   :  { %v642_v56 = vsel %vm189_vm9, %v638_v55, -inf }
 0x3b1   :  { %643 = vmax.xlane.f32.xlu1 %v642_v56  ;;  %v745_v56 = vld [vmem:[%s2748_s6 + $0x8] sm:$0xff] }
 0x3b5   :  { %259 = vadd.xlane.f32.xlu0 %v258_v58 }
 0x3c1   :  { %1982 = vrot.lane.b32.xlu2 %v1981_v59, %s2767_s26 }
 0x3c9   :  { %661 = vrot.lane.b32.xlu2 %v2311_v52, %s2763_s27 }
 0x3ca   :  { %529 = vrot.lane.b32.xlu1 %v2311_v52, %s2765_s28 }
 0x3d1   :  { %687 = vrot.lane.b32.xlu2 %v2317_v54, %s2763_s27 }
 0x414   :  { %v380_v61 = vpop.xlane.xlu1 %379 }
 0x415   :  { %v382_v0 = vsub.f32 %v374_v37, %v380_v61 }
 0x417   :  { %v385_v3 = vmul.f32 1.442695, %v382_v0 }
 0x418   :  { %v641_v62 = vpop.xlane.xlu0 %640 }
 0x419   :  { %v645_v63 = vsub.f32 %v637_v41, %v641_v62 }
 0x41b   :  { %v647_v1 = vmul.f32 1.442695, %v645_v63 }
 0x41c   :  { %v512_v2 = vpop.xlane.xlu2 %511 }
 0x41d   :  { %2024 = vpow2.f32 %v647_v1  ;;  %v514_v6 = vsub.f32 %v506_v45, %v512_v2 }
 0x41e   :  { %2026 = vpow2.f32 %v385_v3 }
 0x41f   :  { %v517_v12 = vmul.f32 1.442695, %v514_v6 }
 0x420   :  { %v521_v4 = vpop.xlane.xlu0 %520 }
 0x423   :  { %v2025_v5 = vpop.eup %2024 }
 0x424   :  { %v644_v7 = vpop.xlane.xlu1 %643  ;;  %v1983_v8 = vpop.permute.xlu2 %1982  ;;  %v651_v52 = vsel %vm189_vm9, %v2025_v5, 0.0 }
 0x425   :  { %v646_v9 = vsub.f32 %v638_v55, %v644_v7  ;;  %v1984_v10 = vunpack.i.l.bf16 %v1983_v8  ;;  %652 = vadd.xlane.f32.xlu0 %v651_v52  ;;  %v1985_v11 = vunpack.i.h.bf16 %v1983_v8  ;;  %v2027_v15 = vpop.eup %2026  ;;  %v746_v55 = vld [vmem:[%s2748_s6 + $0x10] sm:$0xff] }
 0x426   :  { %v390_v16 = vsel %vm189_vm9, %v2027_v15, 0.0  ;;  %771 = vmatpush.msra.mxu0 %v746_v55 }
 0x427   :  { %v649_v13 = vmul.f32 1.442695, %v646_v9  ;;  %418 = vmatpush.msra.mxu3 %v1984_v10  ;;  %444 = vmatpush.msrb.mxu1 %v1985_v11 }
 0x428   :  { %v260_v14 = vpop.xlane.xlu0 %259  ;;  %772 = vmatpush.msra.mxu0 %v745_v56 }
 0x429   :  { %2028 = vpow2.f32 %v649_v13  ;;  %v2138_v13 = vmov 32.0  }
 0x42a   :  { %2030 = vrcp.f32 %v260_v14 }
 0x42b   :  { %2032 = vpow2.f32 %v517_v12 }
 0x42c   :  { %2034 = vrcp.f32 %v389_v60  ;;  %v662_v27 = vpop.permute.xlu2 %661 }
 0x42d   :  { %391 = vadd.xlane.f32.xlu0 %v390_v16  ;;  %2036 = vrcp.f32 %v521_v4 }
 0x42f   :  { %v2029_v17 = vpop.eup %2028 }
 0x430   :  { %v2031_v18 = vpop.eup %2030  ;;  %v654_v19 = vsel %vm189_vm9, %v2029_v17, 0.0 }
 0x431   :  { %v2033_v20 = vpop.eup %2032  ;;  %655 = vadd.xlane.f32.xlu1 %v654_v19  ;;  %v264_v21 = vmul.f32 %v2031_v18, %v2023_v57  ;;  %v744_v57 = vld [vmem:[%s2748_s6] sm:$0xff] }
 0x432   :  { %v522_v23 = vsel %vm189_vm9, %v2033_v20, 0.0  ;;  %v2035_v24 = vpop.eup %2034  ;;  %773 = vmatpush.msra.mxu0 %v744_v57 }
 0x433   :  { %1882 = vmatmul.msk.f32.vlgmr.msrb.gmra.mxu3 %vm189_vm9, %v264_v21  ;;  %v395_v25 = vmul.f32 %v2035_v24, %v2361_v22  ;;  %v2037_v28 = vpop.eup %2036 }
 0x434   :  { %v527_v29 = vmul.f32 %v2037_v28, %v2380_v50  ;;  %v688_v41 = vpop.permute.xlu2 %687 }
 0x435   :  { %523 = vadd.xlane.f32.xlu0 %v522_v23 }
 0x43b   :  { %1887 = vmatmul.msk.f32.vlgmr.msra.gmra.mxu3 %vm189_vm9, %v395_v25 }
 0x43c   :  { %v530_v26 = vpop.permute.xlu1 %529 }
 0x43d   :  { %550 = vmatpush.msrb.mxu3 %v530_v26 }
 0x43f   :  { %682 = vmatpush.msra.mxu3 %v662_v27 }
 0x443   :  { %1893 = vmatmul.msk.f32.vlgmr.msrb.gmra.mxu3 %vm189_vm9, %v527_v29  ;;  %v849_v29 = vld [vmem:[%s2752_s10 + $0x18] sm:$0xff] }
 0x444   :  { %872 = vmatpush.msrb.mxu2 %v849_v29  ;;  %v1909_v29 = vld [vmem:[%s2746_s4 + $0x30] sm:$0xff] }
 0x449   :  { %555 = vrot.lane.b32.xlu0 %v2317_v54, %s2765_s28 }
 0x498   :  { %v653_v30 = vpop.xlane.xlu0 %652 }
 0x499   :  { %2038 = vrcp.f32 %v653_v30  ;;  %v848_v30 = vld [vmem:[%s2752_s10 + $0x10] sm:$0xff] }
 0x49a   :  { %873 = vmatpush.msrb.mxu2 %v848_v30  ;;  %v1908_v30 = vld [vmem:[%s2746_s4 + $0x28] sm:$0xff] }
 0x49f   :  { %v2039_v31 = vpop.eup %2038 }
 0x4a0   :  { %v659_v32 = vmul.f32 %v2039_v31, %v2025_v5  ;;  %v392_v34 = vpop.xlane.xlu0 %391  ;;  %v847_v31 = vld [vmem:[%s2752_s10 + $0x8] sm:$0xff] }
 0x4a1   :  { %2040 = vrcp.f32 %v392_v34  ;;  %874 = vmatpush.msrb.mxu2 %v847_v31  ;;  %v1907_v31 = vld [vmem:[%s2746_s4 + $0x20] sm:$0xff] }
 0x4a2   :  { %1899 = vmatmul.msk.f32.vlgmr.msra.gmra.mxu3 %vm189_vm9, %v659_v32  ;;  %v846_v32 = vld [vmem:[%s2752_s10] sm:$0xff] }
 0x4a3   :  { %875 = vmatpush.msrb.mxu2 %v846_v32 }
 0x4a4   :  { %v656_v38 = vpop.xlane.xlu1 %655 }
 0x4a7   :  { %v2041_v22 = vpop.eup %2040 }
 0x4a8   :  { %v396_v35 = vmul.f32 %v2041_v22, %v2027_v15  ;;  %v524_v36 = vpop.xlane.xlu0 %523 }
 0x4a9   :  { %2042 = vrcp.f32 %v524_v36 }
 0x4aa   :  { %1888 = vmatmul.msk.f32.vlgmr.msrb.gmra.mxu1 %vm189_vm9, %v396_v35  ;;  %2044 = vrcp.f32 %v656_v38 }
 0x4ab   :  { %2046 = vrcp.f32 %v2138_v13 }
 0x4af   :  { %v2043_v39 = vpop.eup %2042 }
 0x4b0   :  { %v528_v40 = vmul.f32 %v2043_v39, %v2033_v20  ;;  %v2045_v43 = vpop.eup %2044 }
 0x4b1   :  { %v660_v44 = vmul.f32 %v2045_v43, %v2029_v17  ;;  %v2047_v14 = vpop.eup %2046 }
 0x4b2   :  { %v790_v15 = vmul.f32 32.0, %v2047_v14  ;;  %vm794_vm11 = vweird.f32 %v2047_v14 }
 0x4b4   :  { %v791_v16 = vsub.f32 1.0, %v790_v15 }
 0x4b6   :  { %v314_v37 = vpop.f32.mrf.mxu3  ;;  %v792_v17 = vmul.f32 %v2047_v14, %v791_v16 }
 0x4b8   :  { %v793_v18 = vadd.f32 %v2047_v14, %v792_v17 }
 0x4ba   :  { %v2444_v19 = vsel %vm794_vm11, %v2047_v14, %v793_v18 }
 0x4bb   :  { %v556_v54 = vpop.permute.xlu0 %555 }
 0x4bc   :  { %576 = vmatpush.msra.mxu1 %v556_v54  ;;  %v888_v54 = vld [vmem:[%s2754_s12 + $0x18] sm:$0xff] }
 0x4bd   :  { %1894 = vmatmul.msk.f32.vlgmr.msra.gmra.mxu1 %vm189_vm9, %v528_v40  ;;  %911 = vmatpush.msrb.mxu3 %v888_v54  ;;  %v2003_v54 = vld [vmem:[%s2756_s14] ss:$0 sm:$0xff] }
 0x4be   :  { %v420_v42 = vpop.f32.mrf.mxu3  ;;  %708 = vmatpush.msrb.mxu1 %v688_v41 }
 0x4bf   :  { %715 = vrot.lane.b32.xlu2 %v420_v42, %s2769_s29  ;;  %v1999_v42 = vld [vmem:[%s2750_s8] ss:$0 sm:$0xff] }
 0x4c5   :  { %1900 = vmatmul.msk.f32.vlgmr.msrb.gmra.mxu1 %vm189_vm9, %v660_v44 }
 0x4c6   :  { %v552_v45 = vpop.f32.mrf.mxu3 }
 0x4c7   :  { %723 = vrot.lane.b32.xlu2 %v552_v45, %s2771_s30 }
 0x519   :  { %v716_v58 = vpop.permute.xlu2 %715 }
 0x51a   :  { %v737_v60 = vsel %vm189_vm9, %v2375_v33, %v716_v58  ;;  %v1998_v33 = vld [vmem:[%s2749_s7] ss:$0 sm:$0xff] }
 0x521   :  { %v724_v59 = vpop.permute.xlu2 %723 }
 0x522   :  { %v739_v61 = vsel %vm117_vm7, %v737_v60, %v724_v59 }
 0x525   :  { %v684_v47 = vpop.f32.mrf.mxu3 }
 0x526   :  { %731 = vrot.lane.b32.xlu0 %v684_v47, %s2137_s0 }
 0x527   :  { %v446_v48 = vpop.f32.mrf.mxu1 }
 0x528   :  { %717 = vrot.lane.b32.xlu2 %v446_v48, %s2769_s29  ;;  %v2000_v48 = vld [vmem:[%s2751_s9] ss:$0 sm:$0xff] }
 0x53a   :  { %v578_v50 = vpop.f32.mrf.mxu1 }
 0x53b   :  { %725 = vrot.lane.b32.xlu0 %v578_v50, %s2771_s30 }
 0x542   :  { %v710_v51 = vpop.f32.mrf.mxu1 }
 0x543   :  { %733 = vrot.lane.b32.xlu2 %v710_v51, %s2137_s0 }
 0x582   :  { %v718_v0 = vpop.permute.xlu2 %717 }
 0x583   :  { %v738_v1 = vsel %vm189_vm9, %v314_v37, %v718_v0 }
 0x598   :  { %v732_v62 = vpop.permute.xlu0 %731 }
 0x599   :  { %v742_v63 = vsel %vm741_vm10, %v739_v61, %v732_v62 }
 0x59a   :  { %1901 = vmatmul.msk.f32.vlgmr.msra.gmra.mxu0 %vm156_vm8, %v742_v63 }
 0x59d   :  { %v734_v3 = vpop.permute.xlu2 %733 }
 0x5ad   :  { %v726_v2 = vpop.permute.xlu0 %725 }
 0x5ae   :  { %v740_v4 = vsel %vm117_vm7, %v738_v1, %v726_v2  ;;  %v887_v1 = vld [vmem:[%s2754_s12 + $0x10] sm:$0xff]  ;;  %v886_v2 = vld [vmem:[%s2754_s12 + $0x8] sm:$0xff] }
 0x5af   :  { %v743_v5 = vsel %vm741_vm10, %v740_v4, %v734_v3  ;;  %912 = vmatpush.msrb.mxu3 %v887_v1  ;;  %v885_v3 = vld [vmem:[%s2754_s12] sm:$0xff] }
 0x5b0   :  { %1902 = vmatmul.msk.f32.gmra.mxu0 %vm156_vm8, %v743_v5  ;;  %v2001_v4 = vld [vmem:[%s2753_s11] ss:$0 sm:$0xff] }
 0x5b1   :  { %913 = vmatpush.msrb.mxu3 %v886_v2 }
 0x5b3   :  { %914 = vmatpush.msrb.mxu3 %v885_v3 }
 0x617   :  { %v775_v6 = vpop.f32.mrf.mxu0 }
 0x618   :  { %v776_v7 = vadd.f32 %v1998_v33, %v775_v6 }
 0x61a   :  { %v781_v8 = vadd.f32 %v776_v7, %v2300_v46 }
 0x61c   :  { %v783_v52 = vsel %vm156_vm8, %v781_v8, 0.0 }
 0x61d   :  { %784 = vadd.xlane.f32.xlu0 %v783_v52 }
 0x62d   :  { %v778_v9 = vpop.f32.mrf.mxu0 }
 0x62e   :  { %v779_v10 = vadd.f32 %v1998_v33, %v778_v9  ;;  %v2002_v9 = vld [vmem:[%s2755_s13] ss:$0 sm:$0xff] }
 0x630   :  { %v782_v11 = vadd.f32 %v779_v10, %v2304_v49 }
 0x632   :  { %v786_v12 = vsel %vm156_vm8, %v782_v11, 0.0 }
 0x633   :  { %787 = vadd.xlane.f32.xlu1 %v786_v12 }
 0x690   :  { %v785_v46 = vpop.xlane.xlu0 %784 }
 0x691   :  { %v796_v20 = vmul.f32 %v2444_v19, %v785_v46 }
 0x693   :  { %v798_v21 = vsub.f32 %v781_v8, %v796_v20 }
 0x695   :  { %v800_v23 = vmul.f32 %v798_v21, %v798_v21 }
 0x697   :  { %v802_v49 = vsel %vm156_vm8, %v800_v23, 0.0 }
 0x698   :  { %803 = vadd.xlane.f32.xlu2 %v802_v49 }
 0x6a6   :  { %v788_v24 = vpop.xlane.xlu1 %787 }
 0x6a7   :  { %v797_v25 = vmul.f32 %v2444_v19, %v788_v24 }
 0x6a9   :  { %v799_v26 = vsub.f32 %v782_v11, %v797_v25 }
 0x6ab   :  { %v801_v27 = vmul.f32 %v799_v26, %v799_v26 }
 0x6ad   :  { %v805_v28 = vsel %vm156_vm8, %v801_v27, 0.0 }
 0x6ae   :  { %806 = vadd.xlane.f32.xlu1 %v805_v28  ;;  %v1910_v28 = vld [vmem:[%s2746_s4 + $0x38] sm:$0xff] }
 0x6af   :  { %1008 = vmatpush.msra.mxu1 %v1910_v28 }
 0x6b1   :  { %1009 = vmatpush.msra.mxu1 %v1909_v29 }
 0x6b3   :  { %1010 = vmatpush.msra.mxu1 %v1908_v30 }
 0x6b5   :  { %1011 = vmatpush.msra.mxu1 %v1907_v31 }
 0x70b   :  { %v804_v34 = vpop.xlane.xlu2 %803 }
 0x70c   :  { %v808_v22 = vmul.f32 %v804_v34, %v2444_v19 }
 0x70e   :  { %v810_v35 = vadd.f32 1e-05, %v808_v22 }
 0x710   :  { %2048 = vrsqrt.f32 %v810_v35  ;;  %vm818_vm13 = vweird.f32 %v810_v35 }
 0x716   :  { %v2049_v36 = vpop.eup %2048 }
 0x717   :  { %v813_v37 = vmul.f32 %v2049_v36, %v810_v35  ;;  %vm819_vm12 = vweird.f32 %v2049_v36 }
 0x718   :  { %vm820_vm14 = vmor %vm818_vm13, %vm819_vm12 }
 0x719   :  { %v814_v38 = vmul.f32 %v2049_v36, %v813_v37 }
 0x71b   :  { %v815_v39 = vmul.f32 0.5, %v814_v38 }
 0x71d   :  { %v816_v40 = vsub.f32 1.5, %v815_v39 }
 0x71f   :  { %v817_v41 = vmul.f32 %v2049_v36, %v816_v40 }
 0x721   :  { %v821_v43 = vsel %vm820_vm14, %v2049_v36, %v817_v41  ;;  %v807_v44 = vpop.xlane.xlu1 %806 }
 0x722   :  { %v832_v45 = vmul.f32 %v821_v43, %v798_v21  ;;  %v809_v47 = vmul.f32 %v807_v44, %v2444_v19 }
 0x724   :  { %v838_v50 = vmul.f32 %v1999_v42, %v832_v45  ;;  %v811_v51 = vadd.f32 1e-05, %v809_v47  ;;  %v2004_v45 = vld [vmem:[%s2757_s15] ss:$0 sm:$0xff] }
 0x726   :  { %2050 = vrsqrt.f32 %v811_v51  ;;  %v844_v53 = vadd.f32 %v2000_v48, %v838_v50  ;;  %vm828_vm0 = vweird.f32 %v811_v51 }
 0x728   :  { %1903 = vmatmul.msk.f32.vlgmr.msrb.gmra.mxu2 %vm156_vm8, %v844_v53 }
 0x72c   :  { %v2051_v55 = vpop.eup %2050 }
 0x72d   :  { %v823_v56 = vmul.f32 %v2051_v55, %v811_v51  ;;  %vm829_vm15 = vweird.f32 %v2051_v55 }
 0x72e   :  { %vm830_vm1 = vmor %vm828_vm0, %vm829_vm15 }
 0x72f   :  { %v824_v57 = vmul.f32 %v2051_v55, %v823_v56 }
 0x731   :  { %v825_v58 = vmul.f32 0.5, %v824_v57 }
 0x733   :  { %v826_v59 = vsub.f32 1.5, %v825_v58 }
 0x735   :  { %v827_v60 = vmul.f32 %v2051_v55, %v826_v59 }
 0x737   :  { %v831_v61 = vsel %vm830_vm1, %v2051_v55, %v827_v60 }
 0x738   :  { %v833_v62 = vmul.f32 %v831_v61, %v799_v26 }
 0x73a   :  { %v839_v63 = vmul.f32 %v1999_v42, %v833_v62 }
 0x73c   :  { %v845_v0 = vadd.f32 %v2000_v48, %v839_v63  ;;  %v2005_v63 = vld [vmem:[%s2747_s5 + $0x1] ss:$0 sm:$0xff]  ;;  %s2779_s5 = smov 64  }
 0x73e   :  { %1904 = vmatmul.msk.f32.gmra.mxu2 %vm156_vm8, %v845_v0 }
 0x7ab   :  { %v877_v5 = vpop.f32.mrf.mxu2 }
 0x7ac   :  { %v878_v33 = vadd.f32 %v2001_v4, %v877_v5 }
 0x7ae   :  { %v883_v6 = vmax.f32 %v878_v33, 0.0 }
 0x7b0   :  { %1905 = vmatmul.msk.f32.vlgmr.msrb.gmra.mxu3 %vm156_vm8, %v883_v6 }
 0x7c1   :  { %v880_v7 = vpop.f32.mrf.mxu2 }
 0x7c2   :  { %v881_v8 = vadd.f32 %v2001_v4, %v880_v7 }
 0x7c4   :  { %v884_v52 = vmax.f32 %v881_v8, 0.0 }
 0x7c6   :  { %1906 = vmatmul.msk.f32.gmra.mxu3 %vm156_vm8, %v884_v52 }
 0x833   :  { %v916_v10 = vpop.f32.mrf.mxu3 }
 0x834   :  { %v917_v11 = vadd.f32 %v2002_v9, %v916_v10 }
 0x836   :  { %v922_v12 = vadd.f32 %v917_v11, %v844_v53 }
 0x838   :  { %v924_v13 = vsel %vm156_vm8, %v922_v12, 0.0 }
 0x839   :  { %925 = vadd.xlane.f32.xlu1 %v924_v13 }
 0x849   :  { %v919_v14 = vpop.f32.mrf.mxu3 }
 0x84a   :  { %v920_v15 = vadd.f32 %v2002_v9, %v919_v14 }
 0x84c   :  { %v923_v16 = vadd.f32 %v920_v15, %v845_v0 }
 0x84e   :  { %v927_v17 = vsel %vm156_vm8, %v923_v16, 0.0 }
 0x84f   :  { %928 = vadd.xlane.f32.xlu1 %v927_v17 }
 0x8ac   :  { %v926_v18 = vpop.xlane.xlu1 %925 }
 0x8ad   :  { %v930_v46 = vmul.f32 %v926_v18, %v2444_v19 }
 0x8af   :  { %v932_v20 = vsub.f32 %v922_v12, %v930_v46 }
 0x8b1   :  { %v934_v21 = vmul.f32 %v932_v20, %v932_v20 }
 0x8b3   :  { %v936_v23 = vsel %vm156_vm8, %v934_v21, 0.0 }
 0x8b4   :  { %937 = vadd.xlane.f32.xlu1 %v936_v23 }
 0x8c2   :  { %v929_v49 = vpop.xlane.xlu1 %928 }
 0x8c3   :  { %v931_v24 = vmul.f32 %v929_v49, %v2444_v19 }
 0x8c5   :  { %v933_v25 = vsub.f32 %v923_v16, %v931_v24 }
 0x8c7   :  { %v935_v26 = vmul.f32 %v933_v25, %v933_v25 }
 0x8c9   :  { %v939_v27 = vsel %vm156_vm8, %v935_v26, 0.0 }
 0x8ca   :  { %940 = vadd.xlane.f32.xlu0 %v939_v27 }
 0x927   :  { %v938_v32 = vpop.xlane.xlu1 %937 }
 0x928   :  { %v942_v34 = vmul.f32 %v938_v32, %v2444_v19 }
 0x92a   :  { %v944_v22 = vadd.f32 1e-05, %v942_v34 }
 0x92c   :  { %2052 = vrsqrt.f32 %v944_v22  ;;  %vm952_vm3 = vweird.f32 %v944_v22 }
 0x932   :  { %v2053_v35 = vpop.eup %2052 }
 0x933   :  { %v947_v36 = vmul.f32 %v2053_v35, %v944_v22  ;;  %vm953_vm2 = vweird.f32 %v2053_v35 }
 0x934   :  { %vm954_vm4 = vmor %vm952_vm3, %vm953_vm2 }
 0x935   :  { %v948_v37 = vmul.f32 %v2053_v35, %v947_v36 }
 0x937   :  { %v949_v38 = vmul.f32 0.5, %v948_v37 }
 0x939   :  { %v950_v39 = vsub.f32 1.5, %v949_v38 }
 0x93b   :  { %v951_v40 = vmul.f32 %v2053_v35, %v950_v39 }
 0x93d   :  { %v955_v41 = vsel %vm954_vm4, %v2053_v35, %v951_v40  ;;  %v941_v42 = vpop.xlane.xlu0 %940 }
 0x93e   :  { %v966_v43 = vmul.f32 %v955_v41, %v932_v20  ;;  %v943_v44 = vmul.f32 %v941_v42, %v2444_v19 }
 0x940   :  { %v972_v47 = vmul.f32 %v2003_v54, %v966_v43  ;;  %v945_v48 = vadd.f32 1e-05, %v943_v44 }
 0x942   :  { %2054 = vrsqrt.f32 %v945_v48  ;;  %v2518_v50 = vadd.f32 %v2004_v45, %v972_v47  ;;  %vm962_vm6 = vweird.f32 %v945_v48 }
 0x944   :  { %1912 = vmatmul.msk.f32.vlgmr.msra.gmra.mxu1 %vm156_vm8, %v2518_v50 }
 0x948   :  { %v2055_v51 = vpop.eup %2054 }
 0x949   :  { %v957_v53 = vmul.f32 %v2055_v51, %v945_v48  ;;  %vm963_vm5 = vweird.f32 %v2055_v51 }
 0x94a   :  { %vm964_vm11 = vmor %vm962_vm6, %vm963_vm5 }
 0x94b   :  { %v958_v55 = vmul.f32 %v2055_v51, %v957_v53 }
 0x94d   :  { %v959_v56 = vmul.f32 0.5, %v958_v55 }
 0x94f   :  { %v960_v57 = vsub.f32 1.5, %v959_v56 }
 0x951   :  { %v961_v58 = vmul.f32 %v2055_v51, %v960_v57 }
 0x953   :  { %v965_v59 = vsel %vm964_vm11, %v2055_v51, %v961_v58 }
 0x954   :  { %v967_v60 = vmul.f32 %v965_v59, %v933_v25 }
 0x956   :  { %v973_v61 = vmul.f32 %v2003_v54, %v967_v60 }
 0x958   :  { %v2522_v62 = vadd.f32 %v2004_v45, %v973_v61 }
 0x95a   :  { %1913 = vmatmul.msk.f32.gmra.mxu1 %vm156_vm8, %v2522_v62 }
 0x9c1   :  { %v1013_v0 = vpop.f32.mrf.mxu1 }
 0x9c2   :  { %v2529_v1 = vadd.f32 %v2005_v63, %v1013_v0 }
 0x9c4   :  { %1151 = vrot.lane.b32.xlu0 %v2529_v1, %s2124_s1  ;;  %1020 = vrot.lane.b32.xlu1 %v2529_v1, %s2125_s21 }
 0x9cc   :  { %1149 = vrot.lane.b32.xlu1 %v2529_v1, %s2127_s20 }
 0x9d7   :  { %v1016_v2 = vpop.f32.mrf.mxu1 }
 0x9d8   :  { %v2537_v3 = vadd.f32 %v2005_v63, %v1016_v2 }
 0x9da   :  { %1047 = vrot.lane.b32.xlu2 %v2537_v3, %s2125_s21  ;;  %1179 = vrot.lane.b32.xlu0 %v2537_v3, %s2124_s1  ;;  %v1986_v36 = vpack.i.bf16 %v2537_v3, %v2529_v1  ;;  %s2780_s1 = smov 56   ;;  %s2781_s21 = smov 48  }
 0x9db   :  { %1177 = vrot.lane.b32.xlu1 %v2537_v3, %s2127_s20  ;;  %s2782_s20 = smov 40  }
 0x9e2   :  { %1283 = vrot.lane.b32.xlu2 %v2529_v1, %s2128_s2  ;;  %1281 = vrot.lane.b32.xlu0 %v2529_v1, %s2129_s23 }
 0x9e3   :  { %1415 = vrot.lane.b32.xlu1 %v2529_v1, %s2131_s25 }
 0x9ea   :  { %1311 = vrot.lane.b32.xlu2 %v2537_v3, %s2128_s2  ;;  %1309 = vrot.lane.b32.xlu0 %v2537_v3, %s2129_s23  ;;  %s2783_s2 = smov 8   ;;  %s2784_s23 = smov 16  }
 0x9eb   :  { %1443 = vrot.lane.b32.xlu1 %v2537_v3, %s2131_s25 }
 0x9f2   :  { %1413 = vrot.lane.b32.xlu2 %v2529_v1, %s2130_s24  ;;  %1441 = vrot.lane.b32.xlu0 %v2537_v3, %s2130_s24 }
 0xa34   :  { %v1048_v4 = vpop.permute.xlu2 %1047 }
 0xa35   :  { %1916 = vmatpush.xpose.msk.msra.mxu2 %vm189_vm9, %v1048_v4 }
 0xa36   :  { %v1152_v5 = vpop.permute.xlu0 %1151  ;;  %v1021_v33 = vpop.permute.xlu1 %1020 }
 0xa37   :  { %1914 = vmatpush.xpose.msk.msrb.mxu0 %vm189_vm9, %v1021_v33 }
 0xa38   :  { %1917 = vmatmul.msk.f32.vlgmr.msra.gmra.mxu2 %vm189_vm9, %v2537_v3 }
 0xa3a   :  { %1915 = vmatmul.msk.f32.vlgmr.msrb.gmra.mxu0 %vm189_vm9, %v2529_v1 }
 0xa3b   :  { %1920 = vmatpush.xpose.msk.msra.mxu0 %vm189_vm9, %v1152_v5 }
 0xa3c   :  { %v1284_v6 = vpop.permute.xlu2 %1283 }
 0xa3e   :  { %v1150_v7 = vpop.permute.xlu1 %1149 }
 0xa3f   :  { %1926 = vmatpush.xpose.msk.msrb.mxu0 %vm189_vm9, %v1284_v6 }
 0xa42   :  { %1921 = vmatmul.msk.f32.vlgmr.msra.gmra.mxu0 %vm189_vm9, %v1150_v7 }
 0xa44   :  { %v1312_v52 = vpop.permute.xlu2 %1311 }
 0xa4c   :  { %v1180_v8 = vpop.permute.xlu0 %1179  ;;  %v1414_v12 = vpop.permute.xlu2 %1413 }
 0xa4d   :  { %v1178_v9 = vpop.permute.xlu1 %1177  ;;  %1922 = vmatpush.xpose.msk.msrb.mxu2 %vm189_vm9, %v1180_v8 }
 0xa50   :  { %1923 = vmatmul.msk.f32.vlgmr.msrb.gmra.mxu2 %vm189_vm9, %v1178_v9 }
 0xa51   :  { %1928 = vmatpush.xpose.msk.msra.mxu2 %vm189_vm9, %v1312_v52 }
 0xa54   :  { %v1282_v10 = vpop.permute.xlu0 %1281 }
 0xa55   :  { %v1416_v11 = vpop.permute.xlu1 %1415  ;;  %1927 = vmatmul.msk.f32.vlgmr.msrb.gmra.mxu0 %vm189_vm9, %v1282_v10 }
 0xa56   :  { %1932 = vmatpush.xpose.msk.msra.mxu0 %vm189_vm9, %v1416_v11 }
 0xa5c   :  { %v1310_v13 = vpop.permute.xlu0 %1309 }
 0xa5d   :  { %v1444_v14 = vpop.permute.xlu1 %1443  ;;  %1929 = vmatmul.msk.f32.vlgmr.msra.gmra.mxu2 %vm189_vm9, %v1310_v13  ;;  %1933 = vmatmul.msk.f32.vlgmr.msra.gmra.mxu0 %vm189_vm9, %v1414_v12 }
 0xa5e   :  { %1934 = vmatpush.xpose.msk.msrb.mxu2 %vm189_vm9, %v1444_v14 }
 0xa64   :  { %v1442_v15 = vpop.permute.xlu0 %1441 }
 0xa65   :  { %1935 = vmatmul.msk.f32.vlgmr.msrb.gmra.mxu2 %vm189_vm9, %v1442_v15 }
 0xab7   :  { %v1043_v16 = vpop.f32.mrf.mxu0 }
 0xab8   :  { %v1073_v17 = vmul.f32 0.35355338, %v1043_v16 }
 0xaba   :  { %v1075_v18 = vsel %vm189_vm9, %v1073_v17, -inf }
 0xabb   :  { %1076 = vmax.xlane.f32.xlu2 %v1075_v18  ;;  %v1070_v23 = vpop.f32.mrf.mxu2 }
 0xabc   :  { %v1074_v47 = vmul.f32 0.35355338, %v1070_v23 }
 0xabe   :  { %v1078_v53 = vsel %vm189_vm9, %v1074_v47, -inf }
 0xabf   :  { %v1174_v46 = vpop.f32.mrf.mxu0 }
 0xac0   :  { %v1205_v20 = vmul.f32 0.35355338, %v1174_v46 }
 0xac2   :  { %v1207_v21 = vsel %vm189_vm9, %v1205_v20, -inf }
 0xac3   :  { %1208 = vmax.xlane.f32.xlu1 %v1207_v21 }
 0xad2   :  { %v1306_v49 = vpop.f32.mrf.mxu0 }
 0xad3   :  { %v1337_v24 = vmul.f32 0.35355338, %v1306_v49  ;;  %v1202_v25 = vpop.f32.mrf.mxu2 }
 0xad4   :  { %v1206_v26 = vmul.f32 0.35355338, %v1202_v25 }
 0xad5   :  { %v1339_v27 = vsel %vm189_vm9, %v1337_v24, -inf }
 0xad6   :  { %1340 = vmax.xlane.f32.xlu2 %v1339_v27  ;;  %v1210_v28 = vsel %vm189_vm9, %v1206_v26, -inf }
 0xad7   :  { %1211 = vmax.xlane.f32.xlu1 %v1210_v28 }
 0xada   :  { %v1438_v29 = vpop.f32.mrf.mxu0 }
 0xadb   :  { %v1469_v30 = vmul.f32 0.35355338, %v1438_v29 }
 0xadd   :  { %v1471_v31 = vsel %vm189_vm9, %v1469_v30, -inf }
 0xade   :  { %1472 = vmax.xlane.f32.xlu2 %v1471_v31 }
 0xae0   :  { %v1334_v32 = vpop.f32.mrf.mxu2 }
 0xae1   :  { %v1338_v56 = vmul.f32 0.35355338, %v1334_v32 }
 0xae3   :  { %v1342_v59 = vsel %vm189_vm9, %v1338_v56, -inf }
 0xae8   :  { %v1466_v34 = vpop.f32.mrf.mxu2 }
 0xae9   :  { %v2584_v22 = vmul.f32 0.35355338, %v1466_v34 }
 0xaeb   :  { %v1474_v35 = vsel %vm189_vm9, %v2584_v22, -inf }
 0xaec   :  { %1475 = vmax.xlane.f32.xlu1 %v1474_v35 }
 0xb05   :  { %1987 = vrot.lane.b32.xlu1 %v1986_v36, %s2779_s5 }
 0xb2e   :  { %v1077_v37 = vpop.xlane.xlu2 %1076 }
 0xb2f   :  { %v1081_v38 = vsub.f32 %v1073_v17, %v1077_v37 }
 0xb31   :  { %v1083_v39 = vmul.f32 1.442695, %v1081_v38 }
 0xb33   :  { %2056 = vpow2.f32 %v1083_v39 }
 0xb36   :  { %v1209_v40 = vpop.xlane.xlu1 %1208 }
 0xb37   :  { %v1213_v54 = vsub.f32 %v1205_v20, %v1209_v40 }
 0xb39   :  { %v2057_v41 = vpop.eup %2056  ;;  %v1215_v42 = vmul.f32 1.442695, %v1213_v54 }
 0xb3a   :  { %v1087_v43 = vsel %vm189_vm9, %v2057_v41, 0.0 }
 0xb3b   :  { %2058 = vpow2.f32 %v1215_v42  ;;  %1088 = vadd.xlane.f32.xlu2 %v1087_v43 }
 0xb41   :  { %v2059_v44 = vpop.eup %2058 }
 0xb42   :  { %v1219_v45 = vsel %vm189_vm9, %v2059_v44, 0.0 }
 0xb43   :  { %1220 = vadd.xlane.f32.xlu0 %v1219_v45 }
 0xb49   :  { %v1341_v48 = vpop.xlane.xlu2 %1340 }
 0xb4a   :  { %v1345_v51 = vsub.f32 %v1337_v24, %v1341_v48  ;;  %v1212_v4 = vpop.xlane.xlu1 %1211 }
 0xb4b   :  { %1079 = vmax.xlane.f32.xlu0 %v1078_v53  ;;  %v1214_v8 = vsub.f32 %v1206_v26, %v1212_v4 }
 0xb4c   :  { %v1347_v55 = vmul.f32 1.442695, %v1345_v51 }
 0xb4d   :  { %v1217_v52 = vmul.f32 1.442695, %v1214_v8 }
 0xb4e   :  { %2060 = vpow2.f32 %v1347_v55 }
 0xb51   :  { %v1473_v57 = vpop.xlane.xlu2 %1472 }
 0xb52   :  { %v1477_v58 = vsub.f32 %v1469_v30, %v1473_v57 }
 0xb53   :  { %1992 = vrot.lane.b32.xlu2 %v1986_v36, %s2780_s1  ;;  %1343 = vmax.xlane.f32.xlu0 %v1342_v59 }
 0xb54   :  { %v1479_v60 = vmul.f32 1.442695, %v1477_v58  ;;  %v2061_v61 = vpop.eup %2060 }
 0xb55   :  { %v1351_v63 = vsel %vm189_vm9, %v2061_v61, 0.0 }
 0xb56   :  { %2062 = vpow2.f32 %v1479_v60 }
 0xb57   :  { %2064 = vpow2.f32 %v1217_v52 }
 0xb5b   :  { %1352 = vadd.xlane.f32.xlu0 %v1351_v63 }
 0xb5c   :  { %v2597_v0 = vpop.eup %2062 }
 0xb5d   :  { %v1483_v2 = vsel %vm189_vm9, %v2597_v0, 0.0  ;;  %v2603_v9 = vpop.eup %2064 }
 0xb5e   :  { %v1222_v10 = vsel %vm189_vm9, %v2603_v9, 0.0 }
 0xb5f   :  { %v1476_v5 = vpop.xlane.xlu1 %1475 }
 0xb60   :  { %v1478_v35 = vsub.f32 %v2584_v22, %v1476_v5  ;;  %v1941_v5 = vld [vmem:[%s2748_s6 + $0x38] sm:$0xff] }
 0xb61   :  { %1603 = vmatpush.msrb.mxu0 %v1941_v5 }
 0xb62   :  { %v1481_v36 = vmul.f32 1.442695, %v1478_v35 }
 0xb63   :  { %1484 = vadd.xlane.f32.xlu0 %v1483_v2 }
 0xb77   :  { %1361 = vrot.lane.b32.xlu0 %v2529_v1, %s2781_s21  ;;  %v1988_v33 = vpop.permute.xlu1 %1987 }
 0xb78   :  { %v1990_v6 = vunpack.i.h.bf16 %v1988_v33  ;;  %v1989_v7 = vunpack.i.l.bf16 %v1988_v33  ;;  %v1940_v33 = vld [vmem:[%s2748_s6 + $0x30] sm:$0xff] }
 0xb79   :  { %1604 = vmatpush.msrb.mxu0 %v1940_v33 }
 0xb7a   :  { %1118 = vmatpush.msra.mxu3 %v1989_v7  ;;  %1144 = vmatpush.msrb.mxu1 %v1990_v6  ;;  %v1939_v6 = vld [vmem:[%s2748_s6 + $0x28] sm:$0xff]  ;;  %v1938_v7 = vld [vmem:[%s2748_s6 + $0x20] sm:$0xff] }
 0xb7b   :  { %1605 = vmatpush.msrb.mxu0 %v1939_v6 }
 0xb7d   :  { %1606 = vmatpush.msrb.mxu0 %v1938_v7 }
 0xba1   :  { %1223 = vadd.xlane.f32.xlu0 %v1222_v10 }
 0xbae   :  { %v1089_v11 = vpop.xlane.xlu2 %1088 }
 0xbaf   :  { %2066 = vrcp.f32 %v1089_v11 }
 0xbb5   :  { %v2067_v12 = vpop.eup %2066  ;;  %1387 = vrot.lane.b32.xlu0 %v2537_v3, %s2781_s21 }
 0xbb6   :  { %v1095_v13 = vmul.f32 %v2067_v12, %v2057_v41  ;;  %v1993_v14 = vpop.permute.xlu2 %1992  ;;  %v1221_v15 = vpop.xlane.xlu0 %1220 }
 0xbb7   :  { %v1995_v16 = vunpack.i.h.bf16 %v1993_v14  ;;  %v1994_v17 = vunpack.i.l.bf16 %v1993_v14  ;;  %2068 = vrcp.f32 %v1221_v15 }
 0xbb8   :  { %1918 = vmatmul.msk.f32.vlgmr.msra.gmra.mxu3 %vm189_vm9, %v1095_v13 }
 0xbb9   :  { %1250 = vmatpush.msrb.mxu3 %v1994_v17  ;;  %1276 = vmatpush.msra.mxu1 %v1995_v16 }
 0xbbd   :  { %v2069_v18 = vpop.eup %2068  ;;  %1519 = vrot.lane.b32.xlu0 %v2537_v3, %s2782_s20 }
 0xbbe   :  { %v1227_v46 = vmul.f32 %v2069_v18, %v2059_v44  ;;  %v1080_v20 = vpop.xlane.xlu0 %1079 }
 0xbbf   :  { %v1082_v21 = vsub.f32 %v1074_v47, %v1080_v20 }
 0xbc0   :  { %1924 = vmatmul.msk.f32.vlgmr.msrb.gmra.mxu3 %vm189_vm9, %v1227_v46  ;;  %v2006_v46 = vld [vmem:[%s2749_s7 + $0x1] ss:$0 sm:$0xff] }
 0xbc1   :  { %v1085_v23 = vmul.f32 1.442695, %v1082_v21 }
 0xbc3   :  { %2070 = vpow2.f32 %v1085_v23 }
 0xbc6   :  { %v1344_v49 = vpop.xlane.xlu0 %1343 }
 0xbc7   :  { %v1346_v24 = vsub.f32 %v1338_v56, %v1344_v49 }
 0xbc9   :  { %v2071_v25 = vpop.eup %2070  ;;  %v1349_v26 = vmul.f32 1.442695, %v1346_v24 }
 0xbca   :  { %v1090_v27 = vsel %vm189_vm9, %v2071_v25, 0.0 }
 0xbcb   :  { %2072 = vpow2.f32 %v1349_v26  ;;  %1091 = vadd.xlane.f32.xlu2 %v1090_v27 }
 0xbce   :  { %v1353_v3 = vpop.xlane.xlu0 %1352 }
 0xbcf   :  { %2074 = vrcp.f32 %v1353_v3 }
 0xbd0   :  { %2076 = vpow2.f32 %v1481_v36 }
 0xbd1   :  { %v2073_v28 = vpop.eup %2072 }
 0xbd2   :  { %v1354_v29 = vsel %vm189_vm9, %v2073_v28, 0.0 }
 0xbd3   :  { %1355 = vadd.xlane.f32.xlu1 %v1354_v29 }
 0xbd5   :  { %v2075_v31 = vpop.eup %2074 }
 0xbd6   :  { %v1485_v30 = vpop.xlane.xlu0 %1484  ;;  %v1359_v32 = vmul.f32 %v2075_v31, %v2061_v61  ;;  %v2077_v37 = vpop.eup %2076 }
 0xbd7   :  { %v1486_v38 = vsel %vm189_vm9, %v2077_v37, 0.0  ;;  %2078 = vrcp.f32 %v1485_v30 }
 0xbe3   :  { %1493 = vrot.lane.b32.xlu2 %v2529_v1, %s2782_s20  ;;  %v2079_v1 = vpop.eup %2078 }
 0xbe4   :  { %v1491_v43 = vmul.f32 %v2079_v1, %v2597_v0 }
 0xbe9   :  { %v1362_v34 = vpop.permute.xlu0 %1361 }
 0xbea   :  { %1382 = vmatpush.msra.mxu3 %v1362_v34 }
 0xbeb   :  { %1930 = vmatmul.msk.f32.vlgmr.msra.gmra.mxu3 %vm189_vm9, %v1359_v32 }
 0xc0c   :  { %1487 = vadd.xlane.f32.xlu2 %v1486_v38  ;;  %v1948_v38 = vld [vmem:[%s2752_s10 + $0x28] sm:$0xff] }
 0xc14   :  { %v1224_v40 = vpop.xlane.xlu0 %1223 }
 0xc27   :  { %v1388_v22 = vpop.permute.xlu0 %1387 }
 0xc2f   :  { %v1520_v53 = vpop.permute.xlu0 %1519 }
 0xc3b   :  { %v1120_v39 = vpop.f32.mrf.mxu3 }
 0xc3e   :  { %v1092_v54 = vpop.xlane.xlu2 %1091 }
 0xc3f   :  { %2080 = vrcp.f32 %v1092_v54 }
 0xc40   :  { %2082 = vrcp.f32 %v1224_v40 }
 0xc43   :  { %v1252_v41 = vpop.f32.mrf.mxu3 }
 0xc44   :  { %1547 = vrot.lane.b32.xlu0 %v1252_v41, %s2783_s2 }
 0xc45   :  { %v2081_v42 = vpop.eup %2080 }
 0xc46   :  { %v1096_v44 = vmul.f32 %v2081_v42, %v2071_v25  ;;  %v1494_v45 = vpop.permute.xlu2 %1493  ;;  %v1356_v47 = vpop.xlane.xlu1 %1355 }
 0xc47   :  { %1514 = vmatpush.msrb.mxu3 %v1494_v45  ;;  %v2083_v48 = vpop.eup %2082  ;;  %2084 = vrcp.f32 %v1356_v47  ;;  %v2007_v47 = vld [vmem:[%s2750_s8 + $0x1] ss:$0 sm:$0xff] }
 0xc48   :  { %1919 = vmatmul.msk.f32.vlgmr.msrb.gmra.mxu1 %vm189_vm9, %v1096_v44  ;;  %1936 = vmatmul.msk.f32.vlgmr.msrb.gmra.mxu3 %vm189_vm9, %v1491_v43  ;;  %v1228_v51 = vmul.f32 %v2083_v48, %v2603_v9 }
 0xc49   :  { %1408 = vmatpush.msrb.mxu1 %v1388_v22 }
 0xc4d   :  { %v2085_v55 = vpop.eup %2084 }
 0xc4e   :  { %v1360_v56 = vmul.f32 %v2085_v55, %v2073_v28 }
 0xc50   :  { %1925 = vmatmul.msk.f32.vlgmr.msra.gmra.mxu1 %vm189_vm9, %v1228_v51 }
 0xc51   :  { %1540 = vmatpush.msra.mxu1 %v1520_v53  ;;  %v2008_v53 = vld [vmem:[%s2751_s9 + $0x1] ss:$0 sm:$0xff] }
 0xc58   :  { %1931 = vmatmul.msk.f32.vlgmr.msrb.gmra.mxu1 %vm189_vm9, %v1360_v56 }
 0xc6e   :  { %v1384_v57 = vpop.f32.mrf.mxu3 }
 0xc6f   :  { %1555 = vrot.lane.b32.xlu1 %v1384_v57, %s2784_s23  ;;  %v1957_v57 = vld [vmem:[%s2754_s12 + $0x38] sm:$0xff] }
 0xc70   :  { %1743 = vmatpush.msra.mxu3 %v1957_v57 }
 0xc7f   :  { %v1488_v58 = vpop.xlane.xlu2 %1487 }
 0xc80   :  { %2086 = vrcp.f32 %v1488_v58 }
 0xc86   :  { %v2087_v59 = vpop.eup %2086 }
 0xc87   :  { %v1492_v60 = vmul.f32 %v2087_v59, %v2077_v37  ;;  %v1949_v37 = vld [vmem:[%s2752_s10 + $0x30] sm:$0xff] }
 0xc89   :  { %1937 = vmatmul.msk.f32.vlgmr.msra.gmra.mxu1 %vm189_vm9, %v1492_v60 }
 0xcb6   :  { %v1548_v8 = vpop.permute.xlu0 %1547 }
 0xcb7   :  { %v1569_v9 = vsel %vm189_vm9, %v1120_v39, %v1548_v8  ;;  %v1947_v39 = vld [vmem:[%s2752_s10 + $0x20] sm:$0xff] }
 0xcc5   :  { %v1146_v61 = vpop.f32.mrf.mxu1 }
 0xccb   :  { %v1516_v63 = vpop.f32.mrf.mxu3 }
 0xccc   :  { %1563 = vrot.lane.b32.xlu0 %v1516_v63, %s2137_s0 }
 0xccd   :  { %v1278_v0 = vpop.f32.mrf.mxu1 }
 0xcd4   :  { %1549 = vrot.lane.b32.xlu0 %v1278_v0, %s2783_s2 }
 0xcd5   :  { %v1410_v2 = vpop.f32.mrf.mxu1 }
 0xcd6   :  { %1557 = vrot.lane.b32.xlu2 %v1410_v2, %s2784_s23  ;;  %s2140_s23 = smov [#allocation2]  }
 0xce1   :  { %v1556_v52 = vpop.permute.xlu1 %1555 }
 0xce2   :  { %v1571_v10 = vsel %vm117_vm7, %v1569_v9, %v1556_v52  ;;  %v1956_v52 = vld [vmem:[%s2754_s12 + $0x30] sm:$0xff]  ;;  %v1955_v9 = vld [vmem:[%s2754_s12 + $0x28] sm:$0xff] }
 0xce3   :  { %1744 = vmatpush.msra.mxu3 %v1956_v52 }
 0xce5   :  { %1745 = vmatpush.msra.mxu3 %v1955_v9 }
 0xd06   :  { %v1542_v4 = vpop.f32.mrf.mxu1 }
 0xd07   :  { %1565 = vrot.lane.b32.xlu0 %v1542_v4, %s2137_s0 }
 0xd30   :  { %v1558_v15 = vpop.permute.xlu2 %1557 }
 0xd3e   :  { %v1564_v11 = vpop.permute.xlu0 %1563 }
 0xd3f   :  { %v1573_v12 = vsel %vm741_vm10, %v1571_v10, %v1564_v11  ;;  %v1954_v10 = vld [vmem:[%s2754_s12 + $0x20] sm:$0xff] }
 0xd40   :  { %1943 = vmatmul.msk.f32.vlgmr.msrb.gmra.mxu0 %vm156_vm8, %v1573_v12  ;;  %1746 = vmatpush.msra.mxu3 %v1954_v10  ;;  %v2009_v11 = vld [vmem:[%s2753_s11 + $0x1] ss:$0 sm:$0xff] }
 0xd46   :  { %v1550_v13 = vpop.permute.xlu0 %1549 }
 0xd47   :  { %v1570_v14 = vsel %vm189_vm9, %v1146_v61, %v1550_v13 }
 0xd48   :  { %v1572_v17 = vsel %vm117_vm7, %v1570_v14, %v1558_v15 }
 0xd79   :  { %v1566_v16 = vpop.permute.xlu0 %1565 }
 0xd7a   :  { %v1574_v18 = vsel %vm741_vm10, %v1572_v17, %v1566_v16 }
 0xd7b   :  { %1944 = vmatmul.msk.f32.gmra.mxu0 %vm156_vm8, %v1574_v18  ;;  %v2010_v18 = vld [vmem:[%s2755_s13 + $0x1] ss:$0 sm:$0xff] }
 0xdbd   :  { %v1608_v20 = vpop.f32.mrf.mxu0 }
 0xdbe   :  { %v1609_v21 = vadd.f32 %v2006_v46, %v1608_v20 }
 0xdc0   :  { %v1614_v23 = vadd.f32 %v1609_v21, %v2518_v50 }
 0xdc2   :  { %v1616_v49 = vsel %vm156_vm8, %v1614_v23, 0.0 }
 0xdc3   :  { %1617 = vadd.xlane.f32.xlu1 %v1616_v49 }
 0xdf8   :  { %v1611_v24 = vpop.f32.mrf.mxu0 }
 0xdf9   :  { %v1612_v25 = vadd.f32 %v2006_v46, %v1611_v24 }
 0xdfb   :  { %v1615_v26 = vadd.f32 %v1612_v25, %v2522_v62  ;;  %v1950_v62 = vld [vmem:[%s2752_s10 + $0x38] sm:$0xff]  ;;  %s1862_s10 = sshll.u32 %s2140_s23, 4  ;;  %s1863_s10 = int_to_ptr.vmem [resolvable:$true] %s1862_s10 }
 0xdfc   :  { %1702 = vmatpush.msra.mxu2 %v1950_v62 }
 0xdfd   :  { %v1619_v27 = vsel %vm156_vm8, %v1615_v26, 0.0 }
 0xdfe   :  { %1620 = vadd.xlane.f32.xlu0 %v1619_v27  ;;  %1703 = vmatpush.msra.mxu2 %v1949_v37 }
 0xe00   :  { %1704 = vmatpush.msra.mxu2 %v1948_v38 }
 0xe02   :  { %1705 = vmatpush.msra.mxu2 %v1947_v39 }
 0xe36   :  { %v1618_v28 = vpop.xlane.xlu1 %1617 }
 0xe37   :  { %v1622_v29 = vmul.f32 %v1618_v28, %v2444_v19 }
 0xe39   :  { %v1624_v3 = vsub.f32 %v1614_v23, %v1622_v29 }
 0xe3b   :  { %v1626_v30 = vmul.f32 %v1624_v3, %v1624_v3 }
 0xe3d   :  { %v1628_v31 = vsel %vm156_vm8, %v1626_v30, 0.0 }
 0xe3e   :  { %1629 = vadd.xlane.f32.xlu2 %v1628_v31 }
 0xe71   :  { %v1621_v32 = vpop.xlane.xlu0 %1620 }
 0xe72   :  { %v1623_v50 = vmul.f32 %v1621_v32, %v2444_v19 }
 0xe74   :  { %v1625_v34 = vsub.f32 %v1615_v26, %v1623_v50 }
 0xe76   :  { %v1627_v35 = vmul.f32 %v1625_v34, %v1625_v34 }
 0xe78   :  { %v1631_v36 = vsel %vm156_vm8, %v1627_v35, 0.0 }
 0xe79   :  { %1632 = vadd.xlane.f32.xlu1 %v1631_v36 }
 0xeb1   :  { %v1630_v40 = vpop.xlane.xlu2 %1629 }
 0xeb2   :  { %v1634_v54 = vmul.f32 %v1630_v40, %v2444_v19  ;;  %v1828_v40 = vld [vmem:[%s2758_s16 + $0x18] sm:$0xff] }
 0xeb3   :  { %1848 = vmatpush.msrb.mxu1 %v1828_v40 }
 0xeb4   :  { %v1636_v1 = vadd.f32 1e-05, %v1634_v54  ;;  %v1827_v54 = vld [vmem:[%s2758_s16 + $0x10] sm:$0xff] }
 0xeb5   :  { %1849 = vmatpush.msrb.mxu1 %v1827_v54 }
 0xeb6   :  { %2088 = vrsqrt.f32 %v1636_v1  ;;  %vm1644_vm10 = vweird.f32 %v1636_v1 }
 0xebc   :  { %v2089_v41 = vpop.eup %2088 }
 0xebd   :  { %v1639_v42 = vmul.f32 %v2089_v41, %v1636_v1  ;;  %vm1645_vm7 = vweird.f32 %v2089_v41  ;;  %v1826_v1 = vld [vmem:[%s2758_s16 + $0x8] sm:$0xff] }
 0xebe   :  { %vm1646_vm12 = vmor %vm1644_vm10, %vm1645_vm7  ;;  %1850 = vmatpush.msrb.mxu1 %v1826_v1 }
 0xebf   :  { %v1640_v43 = vmul.f32 %v2089_v41, %v1639_v42  ;;  %v1825_v42 = vld [vmem:[%s2758_s16] sm:$0xff] }
 0xec0   :  { %1851 = vmatpush.msrb.mxu1 %v1825_v42 }
 0xec1   :  { %v1641_v22 = vmul.f32 0.5, %v1640_v43 }
 0xec3   :  { %v1642_v44 = vsub.f32 1.5, %v1641_v22 }
 0xec5   :  { %v1643_v45 = vmul.f32 %v2089_v41, %v1642_v44 }
 0xec7   :  { %v1647_v48 = vsel %vm1646_vm12, %v2089_v41, %v1643_v45 }
 0xec8   :  { %v1658_v51 = vmul.f32 %v1647_v48, %v1624_v3 }
 0xeca   :  { %v1665_v55 = vmul.f32 %v2007_v47, %v1658_v51 }
 0xecc   :  { %v1672_v56 = vadd.f32 %v2008_v53, %v1665_v55 }
 0xece   :  { %1952 = vmatmul.msk.f32.vlgmr.msra.gmra.mxu2 %vm156_vm8, %v1672_v56 }
 0xeec   :  { %v1633_v58 = vpop.xlane.xlu1 %1632 }
 0xeed   :  { %v1635_v59 = vmul.f32 %v1633_v58, %v2444_v19 }
 0xeef   :  { %v1637_v60 = vadd.f32 1e-05, %v1635_v59 }
 0xef1   :  { %2090 = vrsqrt.f32 %v1637_v60  ;;  %vm1654_vm14 = vweird.f32 %v1637_v60 }
 0xef7   :  { %v2091_v61 = vpop.eup %2090 }
 0xef8   :  { %v1649_v63 = vmul.f32 %v2091_v61, %v1637_v60  ;;  %vm1655_vm13 = vweird.f32 %v2091_v61 }
 0xef9   :  { %vm1656_vm15 = vmor %vm1654_vm14, %vm1655_vm13 }
 0xefa   :  { %v1650_v0 = vmul.f32 %v2091_v61, %v1649_v63 }
 0xefc   :  { %v1651_v2 = vmul.f32 0.5, %v1650_v0 }
 0xefe   :  { %v1652_v4 = vsub.f32 1.5, %v1651_v2 }
 0xf00   :  { %v1653_v5 = vmul.f32 %v2091_v61, %v1652_v4  ;;  %v2012_v4 = vld [vmem:[%s2757_s15 + $0x1] ss:$0 sm:$0xff] }
 0xf02   :  { %v1657_v33 = vsel %vm1656_vm15, %v2091_v61, %v1653_v5 }
 0xf03   :  { %v1659_v6 = vmul.f32 %v1657_v33, %v1625_v34 }
 0xf05   :  { %v1666_v7 = vmul.f32 %v2007_v47, %v1659_v6  ;;  %v2139_v47 = vmov 2.0  }
 0xf07   :  { %v1673_v8 = vadd.f32 %v2008_v53, %v1666_v7 }
 0xf09   :  { %1953 = vmatmul.msk.f32.gmra.mxu2 %vm156_vm8, %v1673_v8 }
 0xf51   :  { %v1707_v12 = vpop.f32.mrf.mxu2 }
 0xf52   :  { %v1708_v13 = vadd.f32 %v2009_v11, %v1707_v12 }
 0xf54   :  { %v1713_v14 = vmax.f32 %v1708_v13, 0.0 }
 0xf56   :  { %1959 = vmatmul.msk.f32.vlgmr.msra.gmra.mxu3 %vm156_vm8, %v1713_v14 }
 0xf8c   :  { %v1710_v15 = vpop.f32.mrf.mxu2 }
 0xf8d   :  { %v1711_v16 = vadd.f32 %v2009_v11, %v1710_v15 }
 0xf8f   :  { %v1714_v17 = vmax.f32 %v1711_v16, 0.0  ;;  %v2013_v16 = vld [vmem:[%s2759_s17] ss:$0 sm:$0xff] }
 0xf91   :  { %1960 = vmatmul.msk.f32.gmra.mxu3 %vm156_vm8, %v1714_v17 }
 0xfd9   :  { %v1748_v46 = vpop.f32.mrf.mxu3 }
 0xfda   :  { %v1749_v20 = vadd.f32 %v2010_v18, %v1748_v46 }
 0xfdc   :  { %v1754_v21 = vadd.f32 %v1749_v20, %v1672_v56 }
 0xfde   :  { %v1756_v23 = vsel %vm156_vm8, %v1754_v21, 0.0 }
 0xfdf   :  { %1757 = vadd.xlane.f32.xlu0 %v1756_v23 }
0x1014   :  { %v1751_v49 = vpop.f32.mrf.mxu3 }
0x1015   :  { %v1752_v24 = vadd.f32 %v2010_v18, %v1751_v49 }
0x1017   :  { %v1755_v25 = vadd.f32 %v1752_v24, %v1673_v8 }
0x1019   :  { %v1759_v26 = vsel %vm156_vm8, %v1755_v25, 0.0 }
0x101a   :  { %1760 = vadd.xlane.f32.xlu1 %v1759_v26 }
0x1052   :  { %v1758_v27 = vpop.xlane.xlu0 %1757 }
0x1053   :  { %v1762_v28 = vmul.f32 %v1758_v27, %v2444_v19 }
0x1055   :  { %v1764_v29 = vsub.f32 %v1754_v21, %v1762_v28 }
0x1057   :  { %v1766_v3 = vmul.f32 %v1764_v29, %v1764_v29 }
0x1059   :  { %v1768_v30 = vsel %vm156_vm8, %v1766_v3, 0.0 }
0x105a   :  { %1769 = vadd.xlane.f32.xlu0 %v1768_v30 }
0x108d   :  { %v1761_v31 = vpop.xlane.xlu1 %1760 }
0x108e   :  { %v1763_v32 = vmul.f32 %v1761_v31, %v2444_v19 }
0x1090   :  { %v1765_v50 = vsub.f32 %v1755_v25, %v1763_v32 }
0x1092   :  { %v1767_v34 = vmul.f32 %v1765_v50, %v1765_v50 }
0x1094   :  { %v1771_v35 = vsel %vm156_vm8, %v1767_v34, 0.0 }
0x1095   :  { %1772 = vadd.xlane.f32.xlu2 %v1771_v35 }
0x10cd   :  { %v1770_v36 = vpop.xlane.xlu0 %1769 }
0x10ce   :  { %v1774_v62 = vmul.f32 %v1770_v36, %v2444_v19 }
0x10d0   :  { %v1776_v37 = vadd.f32 1e-05, %v1774_v62 }
0x10d2   :  { %2092 = vrsqrt.f32 %v1776_v37  ;;  %vm1784_vm1 = vweird.f32 %v1776_v37 }
0x10d3   :  { %2094 = vrcp.f32 %v2139_v47 }
0x10d8   :  { %v2093_v38 = vpop.eup %2092 }
0x10d9   :  { %v1779_v39 = vmul.f32 %v2093_v38, %v1776_v37  ;;  %v2095_v51 = vpop.eup %2094  ;;  %vm1785_vm0 = vweird.f32 %v2093_v38 }
0x10da   :  { %vm1786_vm2 = vmor %vm1784_vm1, %vm1785_vm0  ;;  %v1818_v57 = vmul.f32 2.0, %v2095_v51  ;;  %vm1822_vm6 = vweird.f32 %v2095_v51 }
0x10db   :  { %v1780_v41 = vmul.f32 %v2093_v38, %v1779_v39 }
0x10dc   :  { %v1819_v63 = vsub.f32 1.0, %v1818_v57 }
0x10dd   :  { %v1781_v44 = vmul.f32 0.5, %v1780_v41 }
0x10de   :  { %v1820_v33 = vmul.f32 %v2095_v51, %v1819_v63 }
0x10df   :  { %v1782_v48 = vsub.f32 1.5, %v1781_v44 }
0x10e0   :  { %v1821_v9 = vadd.f32 %v2095_v51, %v1820_v33 }
0x10e1   :  { %v1783_v53 = vmul.f32 %v2093_v38, %v1782_v48 }
0x10e2   :  { %v1823_v13 = vsel %vm1822_vm6, %v2095_v51, %v1821_v9 }
0x10e3   :  { %v1787_v58 = vsel %vm1786_vm2, %v2093_v38, %v1783_v53 }
0x10e4   :  { %v1798_v61 = vmul.f32 %v1787_v58, %v1764_v29 }
0x1108   :  { %v1773_v43 = vpop.xlane.xlu2 %1772 }
0x1109   :  { %v1775_v22 = vmul.f32 %v1773_v43, %v2444_v19  ;;  %v2011_v19 = vld [vmem:[%s2756_s14 + $0x1] ss:$0 sm:$0xff] }
0x110a   :  { %v1805_v5 = vmul.f32 %v2011_v19, %v1798_v61 }
0x110b   :  { %v1777_v45 = vadd.f32 1e-05, %v1775_v22 }
0x110c   :  { %v1812_v8 = vadd.f32 %v2012_v4, %v1805_v5 }
0x110d   :  { %2096 = vrsqrt.f32 %v1777_v45  ;;  %vm1794_vm4 = vweird.f32 %v1777_v45 }
0x110e   :  { %v1814_v11 = vsel %vm156_vm8, %v1812_v8, 0.0 }
0x1113   :  { %v2097_v55 = vpop.eup %2096 }
0x1114   :  { %v1789_v56 = vmul.f32 %v2097_v55, %v1777_v45  ;;  %vm1795_vm3 = vweird.f32 %v2097_v55 }
0x1115   :  { %vm1796_vm5 = vmor %vm1794_vm4, %vm1795_vm3 }
0x1116   :  { %v1790_v59 = vmul.f32 %v2097_v55, %v1789_v56 }
0x1118   :  { %v1791_v60 = vmul.f32 0.5, %v1790_v59 }
0x111a   :  { %v1792_v0 = vsub.f32 1.5, %v1791_v60 }
0x111c   :  { %v1793_v2 = vmul.f32 %v2097_v55, %v1792_v0 }
0x111e   :  { %v1797_v6 = vsel %vm1796_vm5, %v2097_v55, %v1793_v2 }
0x111f   :  { %v1799_v7 = vmul.f32 %v1797_v6, %v1765_v50 }
0x1121   :  { %v1806_v52 = vmul.f32 %v2011_v19, %v1799_v7 }
0x1123   :  { %v1813_v10 = vadd.f32 %v2012_v4, %v1806_v52 }
0x1125   :  { %v1815_v12 = vsel %vm156_vm8, %v1813_v10, 0.0 }
0x1126   :  { %v1816_v14 = vadd.f32 %v1815_v12, %v1814_v11 }
0x1128   :  { %v1824_v15 = vmul.f32 %v1823_v13, %v1816_v14 }
0x112a   :  { %1963 = vmatmul.msk.f32.vlgmr.msrb.gmra.mxu1 %vm156_vm8, %v1824_v15 }
0x11a7   :  { %v1853_v17 = vpop.f32.mrf.mxu1 }
0x11a8   :  { %v1854_v18 = vadd.f32 %v2013_v16, %v1853_v17 }
0x11aa   :  { %1856 = vst.msk [vmem:[#allocation2] sm:$0xff] %vm189_vm9, %v1854_v18 }
0x11ab   :  { %1867 = dma.vmem_to_hbm [thread:$0]  %s1863_s10, 128, %s1865_s19, [#allocation3]  }
0x11ac   :  { %2122 = dma.done.wait [#allocation3], 128  }
0x11ad   :  { %2123 = vsyncadd [#allocation3], 4294967168 }
0x11ae   :  { %1872 = vsyncpa [#allocation3], 1 }

</bundles_post_ra>
